<compile_context>
chip_gen: v7x
topology: tpu7x:2x2x1
jax: 0.10.0
libtpu: 0.0.40
codegen_flags: <defaults>
</compile_context>

<pallas_src>
import functools

import jax
import jax.numpy as jnp
from jax.experimental import pallas as pl
from jax.experimental.pallas import tpu as pltpu

_LANE = 128
_NEG_INF = -1e30

try:  # generation-aware VMEM budget (v5e/v6e: 128 MiB physical, v7x: 64 MiB)
    _VMEM_CAP = int(pltpu.get_tpu_info().vmem_capacity_bytes)
except Exception:  # conservative fallback, safe on all generations
    _VMEM_CAP = 64 * 1024 * 1024
_VMEM_LIMIT = min((_VMEM_CAP * 3) // 4, 100 * 1024 * 1024)


def _round_up(x, m):
    return (x + m - 1) // m * m


def _choose_tile(n):
    """Largest tile in {512,256,128} keeping >=2 row blocks (v7x megacore) while
    limiting row padding to <= ~1/3 extra (adj traffic grows quadratically)."""
    n128 = _round_up(max(n, 1), _LANE)
    tile = _LANE
    for t in (256, 512):
        n_pad = _round_up(n, t)
        if n_pad // t >= 2 and 3 * n_pad <= 4 * n128:
            tile = t
    return tile


def _pad2(a, rows, cols, dtype):
    out = jnp.zeros((rows, cols), dtype)
    return out.at[: a.shape[0], : a.shape[1]].set(a.astype(dtype))


# ---------------------------------------------------------------------------
# Fused GraphConv:  out = act(adj @ (x @ W) + b)   [+ optional F.normalize]
# ---------------------------------------------------------------------------
def _graph_conv_kernel(adj_ref, x_ref, w_ref, b_ref, o_ref, *, relu, normalize):
    k = pl.program_id(1)

    @pl.when(k == 0)
    def _():
        o_ref[...] = jnp.zeros_like(o_ref)

    # x@W recomputed on the fly for this k-tile (W is VMEM-resident; the tiny
    # recompute hides under the adj tile DMA).  bf16 MXU inputs, f32 accumulate.
    xw = jnp.dot(x_ref[...].astype(jnp.bfloat16), w_ref[...],
                 preferred_element_type=jnp.float32)
    o_ref[...] += jnp.dot(adj_ref[...], xw.astype(jnp.bfloat16),
                          preferred_element_type=jnp.float32)

    @pl.when(k == pl.num_programs(1) - 1)
    def _():
        y = o_ref[...] + b_ref[...]
        if relu:
            y = jnp.where(y > 0.0, y, 0.2 * y)        # nn.LeakyReLU(0.2)
        if normalize:
            # F.normalize(dim=1, eps=1e-12); padded channels are exactly zero so
            # the norm over the padded width equals the norm over valid channels.
            inv = jax.lax.rsqrt(
                jnp.maximum(jnp.sum(y * y, axis=1, keepdims=True), 1e-24))
            y = y * inv
        o_ref[...] = y


def _graph_conv(x_p, adj_p, w, b, tile, relu, normalize):
    # TODO(synk): nn.Dropout is identity in eval mode; training-mode dropout
    # (pltpu.prng_*) is not reproduced here.
    n_pad = adj_p.shape[0]
    ci, co = w.shape
    ci_p, co_p = _round_up(ci, _LANE), _round_up(co, _LANE)
    assert x_p.shape == (n_pad, ci_p)
    w_p = _pad2(w, ci_p, co_p, jnp.bfloat16)
    b_p = _pad2(b.reshape(1, -1), 1, co_p, jnp.float32)
    g = n_pad // tile
    return pl.pallas_call(
        functools.partial(_graph_conv_kernel, relu=relu, normalize=normalize),
        out_shape=jax.ShapeDtypeStruct((n_pad, co_p), jnp.float32),
        grid=(g, g),
        in_specs=[
            pl.BlockSpec((tile, tile), lambda i, k: (i, k)),   # adj (bf16, streamed)
            pl.BlockSpec((tile, ci_p), lambda i, k: (k, 0)),   # x k-tile (f32, streamed)
            pl.BlockSpec((ci_p, co_p), lambda i, k: (0, 0)),   # W (bf16, resident)
            pl.BlockSpec((1, co_p), lambda i, k: (0, 0)),      # bias (f32, resident)
        ],
        out_specs=pl.BlockSpec((tile, co_p), lambda i, k: (i, 0)),  # f32, used as accumulator
        compiler_params=pltpu.CompilerParams(
            dimension_semantics=("parallel", "arbitrary"),
            vmem_limit_bytes=_VMEM_LIMIT),
    )(adj_p, x_p, w_p, b_p)


# ---------------------------------------------------------------------------
# Fused flash attention (two key sweeps in one pallas_call):
#   logits = 300 * xn @ xn.T ; coefs = softmax, thresholded ; x_atten = coefs @ xn
# ---------------------------------------------------------------------------
def _attention_kernel(xnq_ref, xnk_ref, cbias_ref, xatt_ref, coefs_ref,
                      m_ref, l_ref, *, g):
    kj = pl.program_id(1)

    @pl.when(kj == 0)
    def _():
        m_ref[...] = jnp.full_like(m_ref, _NEG_INF)
        l_ref[...] = jnp.zeros_like(l_ref)
        xatt_ref[...] = jnp.zeros_like(xatt_ref)

    # Fully-f32 logits: the 300x scale amplifies any input error, so no bf16 here.
    # Padded key columns receive a -1e30 additive bias (precomputed, streamed).
    logits = jax.lax.dot_general(
        xnq_ref[...], xnk_ref[...],
        dimension_numbers=(((1,), (1,)), ((), ())),
        preferred_element_type=jnp.float32) * 300.0 + cbias_ref[...]

    @pl.when(kj < g)                       # sweep 1: running softmax stats (VMEM only)
    def _():
        m_prev = m_ref[...]
        m_new = jnp.maximum(m_prev, jnp.max(logits, axis=1, keepdims=True))
        l_ref[...] = (l_ref[...] * jnp.exp(m_prev - m_new)
                      + jnp.sum(jnp.exp(logits - m_new), axis=1, keepdims=True))
        m_ref[...] = m_new

    @pl.when(kj >= g)                      # sweep 2: exact coefs + x_atten accumulate
    def _():
        coefs = jnp.exp(logits - m_ref[...]) / l_ref[...]   # exact divide (no approx recip)
        coefs = jnp.where(coefs < 0.001, 0.0, coefs)        # post-softmax threshold
        coefs_ref[...] = coefs                              # lane-dense (tile,tile) store
        xatt_ref[...] += jnp.dot(coefs, xnk_ref[...],
                                 preferred_element_type=jnp.float32)


def _attention(xn_p, col_bias, tile):
    n_pad, c_p = xn_p.shape
    g = n_pad // tile

    def kidx(kj):                       # key-tile index, identical for both sweeps
        return jnp.where(kj < g, kj, kj - g)

    return pl.pallas_call(
        functools.partial(_attention_kernel, g=g),
        out_shape=(jax.ShapeDtypeStruct((n_pad, c_p), jnp.float32),     # x_atten
                   jax.ShapeDtypeStruct((n_pad, n_pad), jnp.float32)),  # coefs
        grid=(g, 2 * g),
        in_specs=[
            pl.BlockSpec((tile, c_p), lambda qi, kj: (qi, 0)),        # q tile (resident/row)
            pl.BlockSpec((tile, c_p), lambda qi, kj: (kidx(kj), 0)),  # k tile (streamed)
            pl.BlockSpec((1, tile), lambda qi, kj: (0, kidx(kj))),    # pad-column bias
        ],
        out_specs=(
            pl.BlockSpec((tile, c_p), lambda qi, kj: (qi, 0)),        # x_atten accumulator
            # coefs block index is pinned to column 0 during sweep 1 (never written
            # there, so no garbage writeback) and tracks the key tile during sweep 2.
            pl.BlockSpec((tile, tile),
                         lambda qi, kj: (qi, jnp.where(kj < g, 0, kj - g))),
        ),
        scratch_shapes=[pltpu.VMEM((tile, 1), jnp.float32),   # running row max
                        pltpu.VMEM((tile, 1), jnp.float32)],  # running row denom
        compiler_params=pltpu.CompilerParams(
            dimension_semantics=("parallel", "arbitrary"),
            vmem_limit_bytes=_VMEM_LIMIT),
    )(xn_p, xn_p, col_bias)


# ---------------------------------------------------------------------------
# Parameters (deterministic xavier_uniform, zero bias) + forward
# ---------------------------------------------------------------------------
def xavier_uniform(key, in_c, out_c):
    bound = jnp.sqrt(6.0 / (in_c + out_c))
    return jax.random.uniform(key, (in_c, out_c), jnp.float32, -bound, bound)


def build_attentive_gcn_params(key, in_channels, out_channels, hidden_layers):
    """Mirrors GCN.__init__ layer parsing ('d' prefixes -> dropout flags)."""
    hl = hidden_layers.split(",")
    if hl[-1] == "d":
        hl = hl[:-1]
    layers = []
    last_c = in_channels
    for c in hl:
        dropout = c[0] == "d"
        c = int(c[1:] if dropout else c)
        key, sub = jax.random.split(key)
        layers.append(dict(w=xavier_uniform(sub, last_c, c),
                           b=jnp.zeros((c,), jnp.float32), relu=True))
        last_c = c
    key, sub = jax.random.split(key)
    layers.append(dict(w=xavier_uniform(sub, last_c, out_channels),
                       b=jnp.zeros((out_channels,), jnp.float32), relu=False))
    return layers


def attentive_gcn_forward(x, adj, layers):
    n, c_in = x.shape
    tile = _choose_tile(n)
    n_pad = _round_up(n, tile)

    # adj feeds the MXU in bf16 (f32 accumulation) -- documented deviation from
    # torch.mm in f32; everything downstream of the GraphConv stack stays f32.
    adj_p = _pad2(adj, n_pad, n_pad, jnp.bfloat16)
    x_p = _pad2(x, n_pad, _round_up(c_in, _LANE), jnp.float32)

    # GraphConv stack; the final F.normalize is fused into the last layer.
    for li, layer in enumerate(layers):
        x_p = _graph_conv(x_p, adj_p, layer["w"], layer["b"], tile,
                          relu=layer["relu"], normalize=(li == len(layers) - 1))

    # add_atten_cos re-normalizes the already-normalized x; that is identity up to
    # fp rounding (for ||x|| >= 1e-12), so x_p is reused for both logits and coefs@x.
    col_bias = jnp.where(jnp.arange(n_pad)[None, :] < n, 0.0,
                         _NEG_INF).astype(jnp.float32)
    xatt_p, coefs_p = _attention(x_p, col_bias, tile)

    c_out = layers[-1]["w"].shape[1]
    return xatt_p[:n, :c_out], coefs_p[:n, :n]


# ---------------------------------------------------------------------------
if __name__ == "__main__":
    key = jax.random.PRNGKey(0)
    n_nodes, in_channels, out_channels = 300, 16, 8   # pads 300 -> 512: tile 256, 2 row blocks
    hidden_layers = "d32"   # one hidden GraphConv(16->32, dropout flag, LeakyReLU)

    k_x, k_adj, k_p = jax.random.split(key, 3)
    x = jax.random.normal(k_x, (n_nodes, in_channels), jnp.float32)
    adj_raw = jax.random.uniform(k_adj, (n_nodes, n_nodes), jnp.float32)
    adj = adj_raw / jnp.sum(adj_raw, axis=1, keepdims=True)  # row-normalized adjacency

    layers = build_attentive_gcn_params(k_p, in_channels, out_channels, hidden_layers)

    x_atten, coefs = attentive_gcn_forward(x, adj, layers)
    jax.block_until_ready((x_atten, coefs))

    assert x_atten.shape == (n_nodes, out_channels)
    assert coefs.shape == (n_nodes, n_nodes)
    assert bool(jnp.all(jnp.isfinite(x_atten))) and bool(jnp.all(jnp.isfinite(coefs)))
    print("KERNEL_OK")
</pallas_src>

<mosaic_0001>
module attributes {stable_mosaic.version = 11 : i64} {
  func.func @_graph_conv_kernel(%arg0: i32, %arg1: i32, %arg2: memref<256x256xbf16, #tpu.memory_space<vmem>>, %arg3: memref<256x128xf32, #tpu.memory_space<vmem>>, %arg4: memref<128x128xbf16, #tpu.memory_space<vmem>>, %arg5: memref<1x128xf32, #tpu.memory_space<vmem>>, %arg6: memref<256x128xf32, #tpu.memory_space<vmem>>) attributes {dimension_semantics = [#tpu.dimension_semantics<parallel>, #tpu.dimension_semantics<arbitrary>], iteration_bounds = array<i64: 2, 2>, scalar_prefetch = 0 : i64, scratch_operands = 0 : i64, tpu.core_type = #tpu.core_type<tc>, window_params = [{transform_indices = @transform_0, window_bounds = array<i64: 256, 256>}, {transform_indices = @transform_1, window_bounds = array<i64: 256, 128>}, {pipeline_mode = #tpu.pipeline_mode<synchronous>, transform_indices = @transform_2, window_bounds = array<i64: 128, 128>}, {pipeline_mode = #tpu.pipeline_mode<synchronous>, transform_indices = @transform_3, window_bounds = array<i64: 1, 128>}, {transform_indices = @transform_4, window_bounds = array<i64: 256, 128>}]} {
    %c0_i32 = arith.constant 0 : i32
    %0 = arith.cmpi eq, %arg1, %c0_i32 : i32
    %1 = arith.extui %0 : i1 to i32
    %c0_i32_0 = arith.constant 0 : i32
    %2 = arith.cmpi ne, %1, %c0_i32_0 : i32
    scf.if %2 {
      %cst_12 = arith.constant 0.000000e+00 : f32
      %16 = vector.broadcast %cst_12 : f32 to vector<256x128xf32>
      %c0_13 = arith.constant 0 : index
      %c0_14 = arith.constant 0 : index
      %17 = vector.load %arg6[%c0_13, %c0_14] : memref<256x128xf32, #tpu.memory_space<vmem>>, vector<256x128xf32>
      tpu.vector_store %arg6[%c0_13, %c0_14], %16 {strides = array<i32>} : memref<256x128xf32, #tpu.memory_space<vmem>>, vector<256x128xf32>,
    } else {
    }
    %c0 = arith.constant 0 : index
    %c0_1 = arith.constant 0 : index
    %3 = vector.load %arg3[%c0, %c0_1] : memref<256x128xf32, #tpu.memory_space<vmem>>, vector<256x128xf32>
    %4 = arith.truncf %3 : vector<256x128xf32> to vector<256x128xbf16>
    %c0_2 = arith.constant 0 : index
    %c0_3 = arith.constant 0 : index
    %5 = vector.load %arg4[%c0_2, %c0_3] : memref<128x128xbf16, #tpu.memory_space<vmem>>, vector<128x128xbf16>
    %cst = arith.constant dense<0.000000e+00> : vector<256x128xf32>
    %6 = tpu.matmul %4, %5, %cst {dimension_numbers = #tpu.dot_dimension_numbers<[1], [0], [0], [1], [0, 0, 1, 1], [], []>} : vector<256x128xbf16>, vector<128x128xbf16>, vector<256x128xf32> -> vector<256x128xf32>
    %c0_4 = arith.constant 0 : index
    %c0_5 = arith.constant 0 : index
    %7 = vector.load %arg6[%c0_4, %c0_5] : memref<256x128xf32, #tpu.memory_space<vmem>>, vector<256x128xf32>
    %c0_6 = arith.constant 0 : index
    %c0_7 = arith.constant 0 : index
    %8 = vector.load %arg2[%c0_6, %c0_7] : memref<256x256xbf16, #tpu.memory_space<vmem>>, vector<256x256xbf16>
    %9 = arith.truncf %6 : vector<256x128xf32> to vector<256x128xbf16>
    %cst_8 = arith.constant dense<0.000000e+00> : vector<256x128xf32>
    %10 = tpu.matmul %8, %9, %cst_8 {dimension_numbers = #tpu.dot_dimension_numbers<[1], [0], [0], [1], [0, 0, 1, 1], [], []>} : vector<256x256xbf16>, vector<256x128xbf16>, vector<256x128xf32> -> vector<256x128xf32>
    %11 = arith.addf %7, %10 : vector<256x128xf32>
    %c0_9 = arith.constant 0 : index
    %c0_10 = arith.constant 0 : index
    %12 = vector.load %arg6[%c0_9, %c0_10] : memref<256x128xf32, #tpu.memory_space<vmem>>, vector<256x128xf32>
    tpu.vector_store %arg6[%c0_9, %c0_10], %11 {strides = array<i32>} : memref<256x128xf32, #tpu.memory_space<vmem>>, vector<256x128xf32>,
    %c1_i32 = arith.constant 1 : i32
    %13 = arith.cmpi eq, %arg1, %c1_i32 : i32
    %14 = arith.extui %13 : i1 to i32
    %c0_i32_11 = arith.constant 0 : i32
    %15 = arith.cmpi ne, %14, %c0_i32_11 : i32
    scf.if %15 {
      %c0_12 = arith.constant 0 : index
      %c0_13 = arith.constant 0 : index
      %16 = vector.load %arg6[%c0_12, %c0_13] : memref<256x128xf32, #tpu.memory_space<vmem>>, vector<256x128xf32>
      %c0_14 = arith.constant 0 : index
      %c0_15 = arith.constant 0 : index
      %17 = vector.load %arg5[%c0_14, %c0_15] : memref<1x128xf32, #tpu.memory_space<vmem>>, vector<1x128xf32>
      %18 = vector.broadcast %17 : vector<1x128xf32> to vector<256x128xf32>
      %19 = arith.addf %16, %18 : vector<256x128xf32>
      %cst_16 = arith.constant 0.000000e+00 : f32
      %20 = vector.broadcast %cst_16 : f32 to vector<256x128xf32>
      %21 = arith.cmpf ogt, %19, %20 : vector<256x128xf32>
      %cst_17 = arith.constant 2.000000e-01 : f32
      %22 = vector.broadcast %cst_17 : f32 to vector<256x128xf32>
      %23 = arith.mulf %22, %19 : vector<256x128xf32>
      %24 = arith.select %21, %19, %23 : vector<256x128xi1>, vector<256x128xf32>
      %c0_18 = arith.constant 0 : index
      %c0_19 = arith.constant 0 : index
      %25 = vector.load %arg6[%c0_18, %c0_19] : memref<256x128xf32, #tpu.memory_space<vmem>>, vector<256x128xf32>
      tpu.vector_store %arg6[%c0_18, %c0_19], %24 {strides = array<i32>} : memref<256x128xf32, #tpu.memory_space<vmem>>, vector<256x128xf32>,
    } else {
    }
    return
  }
  func.func @transform_0(%arg0: i32, %arg1: i32) -> (i32, i32) {
    %c0_i32 = arith.constant 0 : i32
    return %arg0, %arg1 : i32, i32
  }
  func.func @transform_1(%arg0: i32, %arg1: i32) -> (i32, i32) {
    %c0_i32 = arith.constant 0 : i32
    %c0_i32_0 = arith.constant 0 : i32
    return %arg1, %c0_i32 : i32, i32
  }
  func.func @transform_2(%arg0: i32, %arg1: i32) -> (i32, i32) {
    %c0_i32 = arith.constant 0 : i32
    %c0_i32_0 = arith.constant 0 : i32
    %c0_i32_1 = arith.constant 0 : i32
    return %c0_i32, %c0_i32_0 : i32, i32
  }
  func.func @transform_3(%arg0: i32, %arg1: i32) -> (i32, i32) {
    %c0_i32 = arith.constant 0 : i32
    %c0_i32_0 = arith.constant 0 : i32
    %c0_i32_1 = arith.constant 0 : i32
    return %c0_i32, %c0_i32_0 : i32, i32
  }
  func.func @transform_4(%arg0: i32, %arg1: i32) -> (i32, i32) {
    %c0_i32 = arith.constant 0 : i32
    %c0_i32_0 = arith.constant 0 : i32
    return %arg0, %c0_i32 : i32, i32
  }
}

</mosaic_0001>

<bundles_post_ra>
// kernel: tpu_custom_call.1
= control target key start
LH: loop header
LB: loop body
LE: loop exit
PB: predicated region body
PF: predicated region fallthrough
CT: control target
= control target key end

     0   :  { %s2802_s0 = inlined_call_operand.hbm [shape: bf16[512,512], index: 0, kind: input, shape index: {}]   ;;  %s2803_s1 = inlined_call_operand.hbm [shape: f32[512,128], index: 1, kind: input, shape index: {}]   ;;  %s2804_s2 = inlined_call_operand.hbm [shape: bf16[128,128], index: 2, kind: input, shape index: {}]   ;;  %s2805_s3 = inlined_call_operand.vmem [shape: f32[1,128], index: 3, kind: input, shape index: {}]   ;;  %s2806_s4 = inlined_call_operand.hbm [shape: f32[512,128], index: 4, kind: output, shape index: {}]  }
   0x1   :  { %2827 = sst [smem:[#allocation23_spill]] %s2804_s2 }
   0x2   :  { %2828 = sst [smem:[#allocation24_spill]] %s2805_s3 }
   0x3   :  { %2829 = sst [smem:[#allocation25_spill]] %s2806_s4 }
   0x4   :  { %9 = vsyncpa [#allocation3], 0 }
   0x5   :  { %11 = vsyncpa [#allocation3 + $0x1], 0 }
   0x6   :  { %12 = vsyncpa [#allocation6], 0 }
   0x7   :  { %14 = vsyncpa [#allocation6 + $0x1], 0 }
   0x8   :  { %15 = vsyncpa [#allocation4], 0 }
   0x9   :  { %17 = vsyncpa [#allocation4 + $0x1], 0  ;;  %s2158_s15 = smov 0   ;;  %s2160_s16 = smov 0  }
   0xa   :  { %s2162_s17 = smov 0   ;;  %s2164_s18 = smov 0  }
   0xb   :  { %s2166_s19 = smov 0   ;;  %s2168_s20 = smov 0  }
   0xc   :  { %s2170_s21 = smov 0   ;;  %s2172_s22 = smov 0  }
   0xd   :  { %s2174_s23 = smov 0   ;;  %s2176_s24 = smov 0  }
   0xe   :  { %s2178_s25 = smov 0   ;;  %s2180_s26 = smov 0  }
   0xf   :  { %s2182_s27 = smov 0   ;;  %s2184_s28 = smov 0  }
  0x10 LB: > { %2830 = sst [smem:[#allocation13_spill]] %s2067_s15  ;;  %s2225_s29 = sadd.s32 4294967295, %s2119_s28   ;;  %s2119_s28 = sphi %s2184_s28, %s23_s28   ;;  %s2115_s27 = sphi %s2182_s27, %s2890_s27   ;;  %s2111_s26 = sphi %s2180_s26, %s2889_s26   ;;  %s2107_s25 = sphi %s2178_s25, %s2888_s25   ;;  %s2103_s24 = sphi %s2176_s24, %s2887_s24   ;;  %s2099_s23 = sphi %s2174_s23, %s2886_s23   ;;  %s2095_s22 = sphi %s2172_s22, %s2885_s22   ;;  %s2091_s21 = sphi %s2170_s21, %s2884_s21   ;;  %s2087_s20 = sphi %s2168_s20, %s2883_s20   ;;  %s2083_s19 = sphi %s2166_s19, %s2882_s19   ;;  %s2079_s18 = sphi %s2164_s18, %s2881_s18   ;;  %s2075_s17 = sphi %s2162_s17, %s2880_s17   ;;  %s2071_s16 = sphi %s2160_s16, %s2879_s16   ;;  %s2067_s15 = sphi %s2158_s15, %s2878_s15  }
  0x11   : > { %2831 = sst [smem:[#allocation14_spill]] %s2071_s16  ;;  %s1403_s30 = sadd.s32 4294967294, %s2119_s28  }
  0x12   : > { %2832 = sst [smem:[#allocation15_spill]] %s2103_s24  ;;  %p57_p0 = scmp.ne.s32.totalorder %s2095_s22, %s2091_s21 }
  0x13   : > { %2833 = sst [smem:[#allocation16_spill]] %s2107_s25  ;;  %p2809_p1 = scmp.eq.s32.totalorder %s2225_s29, 0 }
  0x14   : > { %2834 = sst [smem:[#allocation17_spill]] %s2225_s29  ;;  %p83_p2 = scmp.ne.s32.totalorder %s2083_s19, %s2079_s18 }
  0x15   : > { %p2234_p3 = por %p2809_p1, %p57_p0  ;;  %p148_p4 = scmp.ne.s32.totalorder %s2075_s17, %s2071_s16 }
  0x16   : > { %p2242_p5 = por %p83_p2, %p2809_p1  ;;  %p149_p6 = scmp.eq.s32.totalorder %s2225_s29, 3 }
  0x17   : > { %s2835_s6 = scalar_select %p2234_p3, 1, 0 }
  0x18   : > { %s2836_s7 = scalar_select %p2242_p5, 1, 0 }
  0x19   : > { %p154_p7 = scmp.ne.s32.totalorder %s2071_s16, %s2067_s15  ;;  %p155_p8 = scmp.eq.s32.totalorder %s1403_s30, 3 }
  0x1a   : > { %2837 = sst [smem:[#allocation18_spill]] %s2836_s7  ;;  %p2249_p9 = por %p149_p6, %p148_p4 }
  0x1b   : > { %p1404_p10 = scmp.ge.s32.totalorder %s2119_s28, 1  ;;  %p2254_p11 = por %p155_p8, %p154_p7 }
  0x1c   : > { %s2838_s8 = scalar_select %p2249_p9, 1, 0 }
  0x1d   : > { %s2840_s9 = scalar_select %p2254_p11, 1, 0 }
  0x1e   : > { %2839 = sst [smem:[#allocation19_spill]] %s2838_s8  ;;  %p162_p12 = scmp.lt.s32.totalorder %s2119_s28, 5 }
  0x1f   : > { %2841 = sst [smem:[#allocation20_spill]] %s2840_s9  ;;  %s2121_s11 = smov [#allocation7]  }
  0x20   : > { %p2259_p13 = pnand %p1404_p10, %p162_p12  ;;  %s174_s12 = sshll.u32 %s2121_s11, 4  ;;  %s175_s12 = int_to_ptr.vmem [resolvable:$true] %s174_s12 }
  0x21   : > { %s2844_s2 = sld [smem:[#allocation23_spill]] }
  0x22   : > { %s2842_s10 = scalar_select %p2259_p13, 1, 0 }
  0x23   : > { %p1681_p0 = pneg %p2259_p13 }
  0x25   : > { %p2267_p2 = pnand %p1681_p0, %p2809_p1 }
  0x27   : > { %s1877_s21 = scalar_lea.hbm %s2844_s2, 1024  ;;  %p1879_p6 = pneg %p2267_p2 }
  0x28   : > { %p1878_p4 = scmp.ne.s32.totalorder %s2844_s2, %s1877_s21  ;;  %p1884_p10 = scmp.lt.u32.totalorder %s1877_s21, %s2844_s2 }
  0x2a   : > { %p1880_p7 = pnand %p1879_p6, %p1878_p4 }
  0x2c   : > { %p1881_p8 = pneg %p1880_p7 }
  0x2e   : > { %p1886_p12 = pnand %p1884_p10, %p1881_p8 }
  0x30   : > { %1889 = shalt.err (!%p1886_p12)
}
  0x31   : > { %s1890_s15 = scalar_lea.vmem %s175_s12, 1024  ;;  %p1898_p9 = scmp.lt.s32.totalorder %s175_s12, %s175_s12 }
  0x32   : > { %p1891_p0 = scmp.ne.s32.totalorder %s175_s12, %s1890_s15  ;;  %p1899_p5 = scmp.lt.s32.totalorder %s1890_s15, %s1890_s15 }
  0x34   : > { %p1893_p1 = pnand %p1891_p0, %p1879_p6  ;;  %p1900_p3 = por %p1899_p5, %p1898_p9 }
  0x36   : > { %p1894_p11 = pneg %p1893_p1 }
  0x38   : > { %p1901_p13 = pnand %p1900_p3, %p1894_p11 }
  0x3a   : > { %1904 = shalt.err (!%p1901_p13)
}
  0x3b   : > { %s2122_s5 = smov 64   ;;  %s2123_s9 = smov 4  }
  0x3c   : > { %1684 = dma.hbm_to_vmem [thread:$0]  (!%p2267_p2), %s2844_s2, 1024, %s175_s12, [#allocation6], %s2122_s5, %s2122_s5, %s2123_s9  }
  0x3d   : > { %s32_s15 = sadd.s32 1, %s2111_s26  ;;  %s35_s21 = sadd.s32 1, %s2115_s27 }
  0x3e   : > { %p33_p1 = scmp.ge.s32.totalorder %s32_s15, 2  ;;  %s44_s30 = sadd.s32 1, %s2099_s23 }
  0x3f   : > { %p51_p3 = scmp.ne.s32.totalorder %s2099_s23, %s2095_s22  ;;  %p2826_p5 = scmp.eq.s32.totalorder %s2119_s28, 0 }
  0x40   : > { %s2892_s15 = smov (%p33_p1, %s32_s15), 0  ;;  %s2894_s21 = smov (!%p33_p1, %s35_s21), %s2115_s27 }
  0x41   : > { %2845 = sst [smem:[#allocation21_spill]] %s2892_s15  ;;  %s2297_s13 = ssub.s32 %s2111_s26, %s2892_s15 }
  0x42   : > { %p37_p9 = scmp.ge.s32.totalorder %s2894_s21, 2  ;;  %p68_p11 = scmp.eq.s32.totalorder %s2297_s13, 0 }
  0x43   : > { %p2303_p13 = por %p2826_p5, %p51_p3  ;;  %p2825_p2 = scmp.lt.s32.totalorder %s2119_s28, 4 }
  0x44   : > { %s2896_s21 = smov (%p37_p9, %s2894_s21), 0  ;;  %s191_s11 = sand.u32 1, %s2099_s23  }
  0x45   : > { %2847 = sst [smem:[#allocation22_spill]] %s2896_s21  ;;  %s1409_s5 = sshll.u32 %s2111_s26, 1 }
  0x46   : > { %s39_s9 = ssub.s32 %s2115_s27, %s2896_s21  ;;  %s1407_s18 = sshll.u32 %s191_s11, 8 }
  0x47   : > { %s41_s14 = sor.u32 %s2297_s13, %s39_s9  ;;  %p136_p4 = scmp.eq.s32.totalorder %s39_s9, 0 }
  0x48   : > { %p42_p6 = scmp.eq.s32.totalorder %s41_s14, 0  ;;  %s2848_s2 = sadd.s32 1, %s2075_s17 }
  0x49   : > { %s2318_s15 = scalar_select %p136_p4, %s2075_s17, %s2848_s2  }
  0x4a   : > { %s2321_s4 = scalar_select %p42_p6, %s2099_s23, %s44_s30  }
  0x4b   : > { %s1468_s8 = sshll.u32 %s2115_s27, 7  ;;  %s195_s3 = scalar_lea.vmem [#allocation2], %s1407_s18 }
  0x4c   : > { %s202_s25 = sadd.s32 %s1468_s8, %s1409_s5  ;;  %s205_s24 = sshll.u32 %s195_s3, 4  ;;  %s2324_s24 = int_to_ptr.vmem [resolvable:$true] %s205_s24 }
  0x4d   : > { %s1411_s16 = sshll.u32 %s202_s25, 6  ;;  %p2335_p7 = pnand %p2825_p2, %p2303_p13 }
  0x4e   : > { %s2329_s21 = scalar_lea.hbm %s2802_s0, %s1411_s16  ;;  %s2339_s3 = scalar_lea.sflag [#allocation3], %s191_s11 }
  0x4f   : > { %s1905_s25 = scalar_lea.hbm %s2329_s21, 4096  ;;  %p1907_p10 = pneg %p2335_p7 }
  0x50   : > { %p1906_p8 = scmp.ne.s32.totalorder %s2329_s21, %s1905_s25  ;;  %s1910_s7 = scalar_lea.hbm %s2802_s0, 16384 }
  0x51   : > { %p1911_p1 = scmp.lt.u32.totalorder %s2329_s21, %s2802_s0  ;;  %p1912_p3 = scmp.lt.u32.totalorder %s1910_s7, %s1905_s25 }
  0x52   : > { %p1908_p12 = pnand %p1907_p10, %p1906_p8  ;;  %p1914_p13 = scmp.lt.u32.totalorder %s1905_s25, %s2329_s21 }
  0x53   : > { %p1913_p9 = por %p1912_p3, %p1911_p1 }
  0x54   : > { %p1909_p0 = pneg %p1908_p12 }
  0x55   : > { %p1915_p4 = por %p1914_p13, %p1913_p9 }
  0x57   : > { %p1916_p6 = pnand %p1915_p4, %p1909_p0 }
  0x59   : > { %1919 = shalt.err (!%p1916_p6)
}
  0x5a   : > { %s1920_s12 = scalar_lea.vmem %s2324_s24, 4096  ;;  %s2124_s11 = smov [#allocation2]  }
  0x5b   : > { %p1921_p8 = scmp.ne.s32.totalorder %s2324_s24, %s1920_s12  ;;  %s1925_s5 = sshll.u32 %s2124_s11, 4  ;;  %s1926_s5 = int_to_ptr.vmem [resolvable:$false] %s1925_s5 }
  0x5c   : > { %s1927_s9 = scalar_lea.vmem %s1926_s5, 8192  ;;  %p1928_p5 = scmp.lt.s32.totalorder %s2324_s24, %s1926_s5 }
  0x5d   : > { %p1923_p12 = pnand %p1921_p8, %p1907_p10  ;;  %p1929_p1 = scmp.lt.s32.totalorder %s1927_s9, %s1920_s12 }
  0x5f   : > { %p1924_p2 = pneg %p1923_p12  ;;  %p1930_p3 = por %p1929_p1, %p1928_p5 }
  0x61   : > { %p1931_p9 = pnand %p1930_p3, %p1924_p2 }
  0x63   : > { %1934 = shalt.err (!%p1931_p9)
}
  0x64   : > { %s2125_s14 = smov 256   ;;  %s2126_s18 = smov 128  }
  0x65   : > { %s2127_s25 = smov 8   ;;  %s215_s16 = sand.u32 1, %s2119_s28  }
  0x66   : > { %1688 = dma.hbm_to_vmem [thread:$0]  (!%p2335_p7), %s2329_s21, 4096, %s2324_s24, %s2339_s3, %s2125_s14, %s2126_s18, %s2127_s25  }
  0x67   : > { %s70_s29 = sadd.s32 1, %s2087_s20  ;;  %p77_p5 = scmp.ne.s32.totalorder %s2087_s20, %s2083_s19 }
  0x68   : > { %s2376_s7 = scalar_select %p68_p11, %s2087_s20, %s70_s29  }
  0x69   : > { %p2850_p2 = scmp.eq.s32.totalorder %s2119_s28, 0  ;;  %s217_s8 = sand.u32 1, %s2087_s20  }
  0x6a   : > { %s1412_s30 = sshll.u32 %s217_s8, 8  ;;  %s1469_s12 = sshll.u32 %s2111_s26, 12 }
  0x6b   : > { %p79_p10 = por %p77_p5, %p2850_p2  ;;  %s2385_s9 = scalar_lea.hbm %s2803_s1, %s1469_s12 }
  0x6c   : > { %s219_s24 = scalar_lea.vmem [#allocation5], %s1412_s30  ;;  %p2851_p7 = scmp.lt.s32.totalorder %s2119_s28, 4 }
  0x6d   : > { %s226_s21 = sshll.u32 %s219_s24, 4  ;;  %s2395_s2 = scalar_lea.sflag [#allocation6], %s215_s16  ;;  %s2393_s21 = int_to_ptr.vmem [resolvable:$true] %s226_s21 }
  0x6e   : > { %p2389_p0 = pnand %p2851_p7, %p79_p10  ;;  %s1935_s3 = scalar_lea.hbm %s2385_s9, 4096 }
  0x6f   : > { %p1936_p11 = scmp.ne.s32.totalorder %s2385_s9, %s1935_s3  ;;  %s1940_s8 = scalar_lea.hbm %s2803_s1, 8192 }
  0x70   : > { %p1937_p13 = pneg %p2389_p0  ;;  %p1941_p8 = scmp.lt.u32.totalorder %s2385_s9, %s2803_s1 }
  0x71   : > { %p1942_p12 = scmp.lt.u32.totalorder %s1940_s8, %s1935_s3  ;;  %p1944_p3 = scmp.lt.u32.totalorder %s1935_s3, %s2385_s9 }
  0x72   : > { %p1938_p4 = pnand %p1937_p13, %p1936_p11 }
  0x73   : > { %p1943_p1 = por %p1942_p12, %p1941_p8 }
  0x74   : > { %p1939_p6 = pneg %p1938_p4 }
  0x75   : > { %p1945_p9 = por %p1944_p3, %p1943_p1 }
  0x77   : > { %p1946_p5 = pnand %p1945_p9, %p1939_p6 }
  0x79   : > { %1949 = shalt.err (!%p1946_p5)
}
  0x7a   : > { %s1950_s16 = scalar_lea.vmem %s2393_s21, 4096  ;;  %s2128_s11 = smov [#allocation5]  }
  0x7b   : > { %p1951_p2 = scmp.ne.s32.totalorder %s2393_s21, %s1950_s16  ;;  %s1955_s5 = sshll.u32 %s2128_s11, 4  ;;  %s1956_s5 = int_to_ptr.vmem [resolvable:$false] %s1955_s5 }
  0x7c   : > { %s1957_s24 = scalar_lea.vmem %s1956_s5, 8192  ;;  %p1958_p11 = scmp.lt.s32.totalorder %s2393_s21, %s1956_s5 }
  0x7d   : > { %p1953_p10 = pnand %p1951_p2, %p1937_p13  ;;  %p1959_p4 = scmp.lt.s32.totalorder %s1957_s24, %s1950_s16 }
  0x7f   : > { %p1954_p7 = pneg %p1953_p10  ;;  %p1960_p8 = por %p1959_p4, %p1958_p11 }
  0x81   : > { %p1961_p12 = pnand %p1960_p8, %p1954_p7 }
  0x83   : > { %1964 = shalt.err (!%p1961_p12)
}
  0x84   : > { %1691 = dma.hbm_to_vmem [thread:$0]  (!%p2389_p0), %s2385_s9, 4096, %s2393_s21, %s2395_s2, %s2126_s18, %s2126_s18, %s2127_s25  }
  0x85   : > { %p2853_p13 = scmp.ne.s32.totalorder %s2842_s10, 0 }
  0x86   : > { %s240_s3 = sand.u32 (!%p2853_p13), 1, %s2095_s22   ;;  %p2854_p6 = scmp.ne.s32.totalorder (!%p2853_p13), %s2835_s6, 0 }
  0x87   : > { %238 = sbr.rel (%p2853_p13) target bundleno = 843 (0x34b), region = 36  ;;  %s1416_s14 = sshll.u32 (!%p2853_p13), %s240_s3, 8 }
  0x88   : > { %s241_s29 = scalar_lea.sflag (!%p2853_p13), [#allocation3], %s240_s3  ;;  %s2429_s8 = scalar_lea.vmem (!%p2853_p13), [#allocation2], %s1416_s14 }
  0x8e   : > { %2050 = dma.done.wait (%p2854_p6), %s241_s29, 4096  }
  0x8f   : > { %2052 = vsyncadd (%p2854_p6), %s241_s29, 4294963200  ;;  %s2855_s13 = sld [smem:[#allocation17_spill]]  ;;  %s2856_s30 = sld [smem:[#allocation18_spill]] }
  0x90   : > { %s251_s18 = sand.u32 1, %s2083_s19  }
  0x91   : > { %s1417_s25 = sshll.u32 %s251_s18, 8 }
  0x92   : > { %s2437_s9 = scalar_lea.vmem [#allocation5], %s1417_s25 }
  0x95   : > { %s249_s12 = sand.u32 1, %s2855_s13   ;;  %p2857_p0 = scmp.ne.s32.totalorder %s2856_s30, 0 }
  0x96   : > { %s250_s10 = scalar_lea.sflag [#allocation6], %s249_s12 }
  0x97   : > { %2054 = dma.done.wait (%p2857_p0), %s250_s10, 4096  }
  0x98   : > { %2056 = vsyncadd (%p2857_p0), %s250_s10, 4294963200  ;;  %p2858_p1 = scmp.eq.s32.totalorder %s2855_s13, 0 }
  0x9a   : > { %2058 = dma.done.wait (%p2858_p1), [#allocation6], 1024   ;;  %p2859_p3 = pmov %p2858_p1 }
  0x9b   : > { %s2860_s6 = sld [smem:[#allocation14_spill]]  ;;  %s2861_s11 = sld [smem:[#allocation15_spill]] }
  0x9c   : > { %2060 = vsyncadd (%p2859_p3), [#allocation6], 4294966272 }
  0xa1   : > { %s284_s21 = sand.u32 1, %s2860_s6   ;;  %p1420_p9 = scmp.ne.s32.totalorder %s2861_s11, 0 }
  0xa2   : > { %s1419_s2 = sshll.u32 %s284_s21, 8  ;;  %v2129_v0 = vmov (!%p1420_p9), 0.0  }
  0xa3   : > { %s2450_s16 = scalar_lea.vmem [#allocation8], %s1419_s2  ;;  %295 = sbr.rel (%p1420_p9) target bundleno = 180 (0xb4), region = 52 }
  0xa4   : > { %296 = vst [vmem:[%s2450_s16] sm:$0xff] (!%p1420_p9), %v2129_v0  ;;  %297 = vst [vmem:[%s2450_s16 + $0x8] sm:$0xff] (!%p1420_p9), %v2129_v0 }
  0xa5   : > { %298 = vst [vmem:[%s2450_s16 + $0x10] sm:$0xff] (!%p1420_p9), %v2129_v0  ;;  %299 = vst [vmem:[%s2450_s16 + $0x18] sm:$0xff] (!%p1420_p9), %v2129_v0 }
  0xa6   : > { %300 = vst [vmem:[%s2450_s16 + $0x20] sm:$0xff] (!%p1420_p9), %v2129_v0  ;;  %301 = vst [vmem:[%s2450_s16 + $0x28] sm:$0xff] (!%p1420_p9), %v2129_v0 }
  0xa7   : > { %302 = vst [vmem:[%s2450_s16 + $0x30] sm:$0xff] (!%p1420_p9), %v2129_v0  ;;  %303 = vst [vmem:[%s2450_s16 + $0x38] sm:$0xff] (!%p1420_p9), %v2129_v0 }
  0xa8   : > { %304 = vst [vmem:[%s2450_s16 + $0x40] sm:$0xff] (!%p1420_p9), %v2129_v0  ;;  %305 = vst [vmem:[%s2450_s16 + $0x48] sm:$0xff] (!%p1420_p9), %v2129_v0 }
  0xa9   : > { %306 = vst [vmem:[%s2450_s16 + $0x50] sm:$0xff] (!%p1420_p9), %v2129_v0  ;;  %307 = vst [vmem:[%s2450_s16 + $0x58] sm:$0xff] (!%p1420_p9), %v2129_v0 }
  0xaa   : > { %308 = vst [vmem:[%s2450_s16 + $0x60] sm:$0xff] %v2129_v0  ;;  %309 = vst [vmem:[%s2450_s16 + $0x68] sm:$0xff] %v2129_v0 }
  0xab   : > { %310 = vst [vmem:[%s2450_s16 + $0x70] sm:$0xff] %v2129_v0  ;;  %311 = vst [vmem:[%s2450_s16 + $0x78] sm:$0xff] %v2129_v0 }
  0xac   : > { %312 = vst [vmem:[%s2450_s16 + $0x80] sm:$0xff] %v2129_v0  ;;  %313 = vst [vmem:[%s2450_s16 + $0x88] sm:$0xff] %v2129_v0 }
  0xad   : > { %314 = vst [vmem:[%s2450_s16 + $0x90] sm:$0xff] %v2129_v0  ;;  %315 = vst [vmem:[%s2450_s16 + $0x98] sm:$0xff] %v2129_v0 }
  0xae   : > { %316 = vst [vmem:[%s2450_s16 + $0xa0] sm:$0xff] %v2129_v0  ;;  %317 = vst [vmem:[%s2450_s16 + $0xa8] sm:$0xff] %v2129_v0 }
  0xaf   : > { %318 = vst [vmem:[%s2450_s16 + $0xb0] sm:$0xff] %v2129_v0  ;;  %319 = vst [vmem:[%s2450_s16 + $0xb8] sm:$0xff] %v2129_v0 }
  0xb0   : > { %320 = vst [vmem:[%s2450_s16 + $0xc0] sm:$0xff] %v2129_v0  ;;  %321 = vst [vmem:[%s2450_s16 + $0xc8] sm:$0xff] %v2129_v0 }
  0xb1   : > { %322 = vst [vmem:[%s2450_s16 + $0xd0] sm:$0xff] %v2129_v0  ;;  %323 = vst [vmem:[%s2450_s16 + $0xd8] sm:$0xff] %v2129_v0 }
  0xb2   : > { %324 = vst [vmem:[%s2450_s16 + $0xe0] sm:$0xff] %v2129_v0  ;;  %325 = vst [vmem:[%s2450_s16 + $0xe8] sm:$0xff] %v2129_v0 }
  0xb3   : > { %326 = vst [vmem:[%s2450_s16 + $0xf0] sm:$0xff] %v2129_v0  ;;  %327 = vst [vmem:[%s2450_s16 + $0xf8] sm:$0xff] %v2129_v0 }
  0xb4 PF: > { %v1821_v1 = vld [vmem:[#allocation7] sm:$0xff]   ;;  %v1822_v2 = vld [vmem:[#allocation7 + $0x8] sm:$0xff]   ;;  %v1823_v3 = vld [vmem:[#allocation7 + $0x10] sm:$0xff]   ;;  %s2862_s5 = sld [smem:[#allocation15_spill]] }
  0xb5   : > { %1607 = vmatprep.subr.bf16.mxu0 %v1821_v1  ;;  %v1824_v4 = vld [vmem:[#allocation7 + $0x18] sm:$0xff]   ;;  %v328_v5 = vld [vmem:[%s2437_s9] sm:$0xff]  ;;  %v329_v6 = vld [vmem:[%s2437_s9 + $0x8] sm:$0xff] }
  0xb6   : > { %1608 = vmatpush3.bf16.msra.mxu0 %v1821_v1  ;;  %v360_v7 = vpack.c.bf16 %v329_v6, %v328_v5  ;;  %v1825_v8 = vld [vmem:[#allocation7 + $0x20] sm:$0xff]   ;;  %v1826_v9 = vld [vmem:[#allocation7 + $0x28] sm:$0xff]   ;;  %v1827_v10 = vld [vmem:[#allocation7 + $0x30] sm:$0xff]  }
  0xb7   : > { %1609 = vmatprep.subr.bf16.mxu0 %v1822_v2  ;;  %v1828_v11 = vld [vmem:[#allocation7 + $0x38] sm:$0xff]   ;;  %v330_v12 = vld [vmem:[%s2437_s9 + $0x10] sm:$0xff]  ;;  %v332_v14 = vld [vmem:[%s2437_s9 + $0x20] sm:$0xff] }
  0xb8   : > { %1623 = vmatprep.mubr.bf16.mxu0 %v360_v7  ;;  %v331_v13 = vld [vmem:[%s2437_s9 + $0x18] sm:$0xff]  ;;  %v333_v15 = vld [vmem:[%s2437_s9 + $0x28] sm:$0xff]  ;;  %v334_v18 = vld [vmem:[%s2437_s9 + $0x30] sm:$0xff] }
  0xb9   : > { %v361_v16 = vpack.c.bf16 %v331_v13, %v330_v12  ;;  %v362_v17 = vpack.c.bf16 %v333_v15, %v332_v14  ;;  %v335_v19 = vld [vmem:[%s2437_s9 + $0x38] sm:$0xff]  ;;  %v336_v20 = vld [vmem:[%s2437_s9 + $0x40] sm:$0xff]  ;;  %v337_v21 = vld [vmem:[%s2437_s9 + $0x48] sm:$0xff] }
  0xba   : > { %1610 = vmatpush3.bf16.msra.mxu0 %v1822_v2  ;;  %v363_v22 = vpack.c.bf16 %v335_v19, %v334_v18  ;;  %v364_v23 = vpack.c.bf16 %v337_v21, %v336_v20  ;;  %v338_v24 = vld [vmem:[%s2437_s9 + $0x50] sm:$0xff]  ;;  %v339_v25 = vld [vmem:[%s2437_s9 + $0x58] sm:$0xff]  ;;  %v340_v26 = vld [vmem:[%s2437_s9 + $0x60] sm:$0xff]  ;;  %p1461_p5 = scmp.ne.s32.totalorder %s2862_s5, 1 }
  0xbb   : > { %1611 = vmatprep.subr.bf16.mxu0 %v1823_v3  ;;  %v341_v27 = vld [vmem:[%s2437_s9 + $0x68] sm:$0xff]  ;;  %v365_v28 = vpack.c.bf16 %v339_v25, %v338_v24  ;;  %v342_v30 = vld [vmem:[%s2437_s9 + $0x70] sm:$0xff]  ;;  %v343_v31 = vld [vmem:[%s2437_s9 + $0x78] sm:$0xff]  ;;  %s2863_s14 = sld [smem:[#allocation24_spill]] (!%p1461_p5) }
  0xbc   : > { %v366_v29 = vpack.c.bf16 %v341_v27, %v340_v26  ;;  %v344_v32 = vld [vmem:[%s2437_s9 + $0x80] sm:$0xff]  ;;  %v345_v33 = vld [vmem:[%s2437_s9 + $0x88] sm:$0xff]  ;;  %v367_v34 = vpack.c.bf16 %v343_v31, %v342_v30  ;;  %v346_v36 = vld [vmem:[%s2437_s9 + $0x90] sm:$0xff] }
  0xbd   : > { %v368_v35 = vpack.c.bf16 %v345_v33, %v344_v32  ;;  %v347_v37 = vld [vmem:[%s2437_s9 + $0x98] sm:$0xff]  ;;  %v348_v38 = vld [vmem:[%s2437_s9 + $0xa0] sm:$0xff]  ;;  %v349_v39 = vld [vmem:[%s2437_s9 + $0xa8] sm:$0xff] }
  0xbe   : > { %1612 = vmatpush3.bf16.msra.mxu0 %v1823_v3  ;;  %v369_v40 = vpack.c.bf16 %v347_v37, %v346_v36  ;;  %v370_v41 = vpack.c.bf16 %v349_v39, %v348_v38  ;;  %v350_v42 = vld [vmem:[%s2437_s9 + $0xb0] sm:$0xff]  ;;  %v351_v43 = vld [vmem:[%s2437_s9 + $0xb8] sm:$0xff]  ;;  %v352_v44 = vld [vmem:[%s2437_s9 + $0xc0] sm:$0xff] }
  0xbf   : > { %1613 = vmatprep.subr.bf16.mxu0 %v1824_v4  ;;  %v353_v45 = vld [vmem:[%s2437_s9 + $0xc8] sm:$0xff]  ;;  %v371_v46 = vpack.c.bf16 %v351_v43, %v350_v42  ;;  %v354_v48 = vld [vmem:[%s2437_s9 + $0xd0] sm:$0xff]  ;;  %v355_v49 = vld [vmem:[%s2437_s9 + $0xd8] sm:$0xff] }
  0xc0   : > { %v372_v47 = vpack.c.bf16 %v353_v45, %v352_v44  ;;  %v356_v50 = vld [vmem:[%s2437_s9 + $0xe0] sm:$0xff]  ;;  %v357_v51 = vld [vmem:[%s2437_s9 + $0xe8] sm:$0xff]  ;;  %v373_v52 = vpack.c.bf16 %v355_v49, %v354_v48  ;;  %v358_v54 = vld [vmem:[%s2437_s9 + $0xf0] sm:$0xff] }
  0xc1   : > { %v374_v53 = vpack.c.bf16 %v357_v51, %v356_v50  ;;  %v359_v55 = vld [vmem:[%s2437_s9 + $0xf8] sm:$0xff]  ;;  %v1831_v57 = vld [vmem:[%s2429_s8 + $0x44] ss:$8 sps:$4 sm:$0xff]   ;;  %v1829_v43 = vld [vmem:[%s2429_s8 + $0x40] ss:$8 sps:$4 sm:$0xff]  }
  0xc2   : > { %1614 = vmatpush3.bf16.msra.mxu0 %v1824_v4  ;;  %v375_v56 = vpack.c.bf16 %v359_v55, %v358_v54  ;;  %905 = vmatprep.mubr.bf16.mxu1 %v1831_v57  ;;  %v1855_v58 = vld [vmem:[%s2429_s8 + $0x4] ss:$8 sps:$4 sm:$0xff]   ;;  %v1853_v44 = vld [vmem:[%s2429_s8] ss:$8 sps:$4 sm:$0xff]   ;;  %v1832_v45 = vld [vmem:[%s2429_s8 + $0x54] ss:$8 sps:$4 sm:$0xff]  }
  0xc3   : > { %1615 = vmatprep.subr.bf16.mxu0 %v1825_v8  ;;  %v1861_v48 = vld [vmem:[%s2429_s8 + $0x10] ss:$8 sps:$4 sm:$0xff]   ;;  %v1835_v49 = vld [vmem:[%s2429_s8 + $0x64] ss:$8 sps:$4 sm:$0xff]   ;;  %v1837_v51 = vld [vmem:[%s2429_s8 + $0x60] ss:$8 sps:$4 sm:$0xff]  }
  0xc4   : > { %v1865_v50 = vld [vmem:[%s2429_s8 + $0x24] ss:$8 sps:$4 sm:$0xff]   ;;  %v1871_v54 = vld [vmem:[%s2429_s8 + $0x34] ss:$8 sps:$4 sm:$0xff]   ;;  %v1840_v55 = vld [vmem:[%s2429_s8 + $0x70] ss:$8 sps:$4 sm:$0xff]  }
  0xc5   : > { %v1841_v57 = vld [vmem:[%s2429_s8 + $0x84] ss:$8 sps:$4 sm:$0xff]  }
  0xc6   : > { %1616 = vmatpush3.bf16.msra.mxu0 %v1825_v8 }
  0xc7   : > { %1617 = vmatprep.subr.bf16.mxu0 %v1826_v9 }
  0xca   : > { %1618 = vmatpush3.bf16.msra.mxu0 %v1826_v9 }
  0xcb   : > { %1619 = vmatprep.subr.bf16.mxu0 %v1827_v10 }
  0xce   : > { %1620 = vmatpush3.bf16.msra.mxu0 %v1827_v10 }
  0xcf   : > { %1621 = vmatprep.subr.bf16.mxu0 %v1828_v11 }
  0xd2   : > { %1622 = vmatpush3.bf16.msra.mxu0 %v1828_v11 }
  0xd5   : > { %1624 = vmatmul.mubr.bf16.vlgmr.msra.gmra.mrb[0].mxu0 %v361_v16 }
  0xd6   : > { %1627 = vmatprep.mubr.bf16.mxu0 %v362_v17 }
  0xdd   : > { %1628 = vmatmul.mubr.bf16.gmra.mrb[4].mxu0 %v363_v22 }
  0xde   : > { %1631 = vmatprep.mubr.bf16.mxu0 %v364_v23 }
  0xe5   : > { %1632 = vmatmul.mubr.bf16.gmra.mrb[8].mxu0 %v365_v28 }
  0xe6   : > { %1635 = vmatprep.mubr.bf16.mxu0 %v366_v29 }
  0xed   : > { %1636 = vmatmul.mubr.bf16.gmra.mrb[12].mxu0 %v367_v34 }
  0xee   : > { %1639 = vmatprep.mubr.bf16.mxu0 %v368_v35 }
  0xf5   : > { %1640 = vmatmul.mubr.bf16.gmra.mrb[16].mxu0 %v369_v40 }
  0xf6   : > { %1643 = vmatprep.mubr.bf16.mxu0 %v370_v41 }
  0xfd   : > { %1644 = vmatmul.mubr.bf16.gmra.mrb[20].mxu0 %v371_v46  ;;  %v1859_v46 = vld [vmem:[%s2429_s8 + $0x14] ss:$8 sps:$4 sm:$0xff]  }
  0xfe   : > { %1647 = vmatprep.mubr.bf16.mxu0 %v372_v47  ;;  %v1834_v47 = vld [vmem:[%s2429_s8 + $0x50] ss:$8 sps:$4 sm:$0xff]  }
 0x105   : > { %1648 = vmatmul.mubr.bf16.gmra.mrb[24].mxu0 %v373_v52  ;;  %v1867_v52 = vld [vmem:[%s2429_s8 + $0x20] ss:$8 sps:$4 sm:$0xff]  }
 0x106   : > { %1651 = vmatprep.mubr.bf16.mxu0 %v374_v53  ;;  %v1838_v53 = vld [vmem:[%s2429_s8 + $0x74] ss:$8 sps:$4 sm:$0xff]  }
 0x10d   : > { %1652 = vmatmul.mubr.bf16.gmra.mrb[28].mxu0 %v375_v56  ;;  %v1873_v56 = vld [vmem:[%s2429_s8 + $0x30] ss:$8 sps:$4 sm:$0xff]  }
 0x10e   : > { %873 = vmatprep.mubr.bf16.mxu0 %v1855_v58  ;;  %v1843_v58 = vld [vmem:[%s2429_s8 + $0x80] ss:$8 sps:$4 sm:$0xff]  }
 0x1a8   : > { %v1625_v59 = vpop.f32.mrb[0].mxu0 }
 0x1a9   : > { %v474_v60 = vpop.f32.mrb[1].mxu0 }
 0x1aa   : > { %v1626_v61 = vpop.f32.mrb[2].mxu0 }
 0x1ab   : > { %v666_v62 = vpack.c.bf16 %v1626_v61, %v1625_v59  ;;  %v477_v63 = vpop.f32.mrb[3].mxu0  ;;  %v1844_v59 = vld [vmem:[%s2429_s8 + $0x94] ss:$8 sps:$4 sm:$0xff]   ;;  %v1847_v61 = vld [vmem:[%s2429_s8 + $0xa4] ss:$8 sps:$4 sm:$0xff]  }
 0x1ac   : > { %v665_v0 = vpack.c.bf16 %v477_v63, %v474_v60  ;;  %v1846_v60 = vld [vmem:[%s2429_s8 + $0x90] ss:$8 sps:$4 sm:$0xff]   ;;  %v1850_v63 = vld [vmem:[%s2429_s8 + $0xb4] ss:$8 sps:$4 sm:$0xff]  }
 0x1b0   : > { %v1629_v1 = vpop.f32.mrb[4].mxu0 }
 0x1b1   : > { %v490_v2 = vpop.f32.mrb[5].mxu0 }
 0x1b2   : > { %v1630_v3 = vpop.f32.mrb[6].mxu0 }
 0x1b3   : > { %v668_v4 = vpack.c.bf16 %v1630_v3, %v1629_v1  ;;  %v493_v5 = vpop.f32.mrb[7].mxu0  ;;  %v1856_v1 = vld [vmem:[%s2429_s8 + $0xc4] ss:$8 sps:$4 sm:$0xff]   ;;  %v1862_v3 = vld [vmem:[%s2429_s8 + $0xd4] ss:$8 sps:$4 sm:$0xff]  }
 0x1b4   : > { %v667_v6 = vpack.c.bf16 %v493_v5, %v490_v2  ;;  %v1858_v2 = vld [vmem:[%s2429_s8 + $0xc0] ss:$8 sps:$4 sm:$0xff]   ;;  %v1868_v5 = vld [vmem:[%s2429_s8 + $0xe4] ss:$8 sps:$4 sm:$0xff]  }
 0x1b8   : > { %v1633_v7 = vpop.f32.mrb[8].mxu0 }
 0x1b9   : > { %v506_v8 = vpop.f32.mrb[9].mxu0 }
 0x1ba   : > { %v1634_v9 = vpop.f32.mrb[10].mxu0 }
 0x1bb   : > { %v670_v10 = vpack.c.bf16 %v1634_v9, %v1633_v7  ;;  %v509_v11 = vpop.f32.mrb[11].mxu0  ;;  %v1874_v7 = vld [vmem:[%s2429_s8 + $0xf4] ss:$8 sps:$4 sm:$0xff]  }
 0x1bc   : > { %v669_v12 = vpack.c.bf16 %v509_v11, %v506_v8  ;;  %v1876_v8 = vld [vmem:[%s2429_s8 + $0xf0] ss:$8 sps:$4 sm:$0xff]   ;;  %v609_v11 = vld [vmem:[%s2450_s16 + $0x40] sm:$0xff] }
 0x1c0   : > { %v1637_v13 = vpop.f32.mrb[12].mxu0 }
 0x1c1   : > { %v522_v14 = vpop.f32.mrb[13].mxu0 }
 0x1c2   : > { %v1638_v15 = vpop.f32.mrb[14].mxu0 }
 0x1c3   : > { %v672_v16 = vpack.c.bf16 %v1638_v15, %v1637_v13  ;;  %v525_v17 = vpop.f32.mrb[15].mxu0  ;;  %v601_v13 = vld [vmem:[%s2450_s16] sm:$0xff] }
 0x1c4   : > { %v671_v18 = vpack.c.bf16 %v525_v17, %v522_v14 }
 0x1c8   : > { %v1641_v19 = vpop.f32.mrb[16].mxu0 }
 0x1c9   : > { %v538_v20 = vpop.f32.mrb[17].mxu0 }
 0x1ca   : > { %v1642_v21 = vpop.f32.mrb[18].mxu0 }
 0x1cb   : > { %v674_v22 = vpack.c.bf16 %v1642_v21, %v1641_v19  ;;  %v541_v23 = vpop.f32.mrb[19].mxu0  ;;  %v610_v19 = vld [vmem:[%s2450_s16 + $0x48] sm:$0xff] }
 0x1cc   : > { %v673_v24 = vpack.c.bf16 %v541_v23, %v538_v20  ;;  %v602_v21 = vld [vmem:[%s2450_s16 + $0x8] sm:$0xff] }
 0x1ce   : > { %1495 = vmatprep.subr.bf16.mxu0 %v673_v24  ;;  %1655 = vmatprep.subr.bf16.mxu1 %v673_v24 }
 0x1cf   : > { %1496 = vmatpush3.bf16.msra.mxu0 %v665_v0  ;;  %1663 = vmatpush3.bf16.msra.mxu1 %v665_v0  ;;  %v1852_v0 = vld [vmem:[%s2429_s8 + $0xb0] ss:$8 sps:$4 sm:$0xff]  }
 0x1d0   : > { %v1645_v25 = vpop.f32.mrb[20].mxu0  ;;  %1497 = vmatprep.subr.bf16.mxu0 %v674_v22  ;;  %1656 = vmatprep.subr.bf16.mxu1 %v674_v22 }
 0x1d1   : > { %v554_v26 = vpop.f32.mrb[21].mxu0 }
 0x1d2   : > { %v1646_v27 = vpop.f32.mrb[22].mxu0 }
 0x1d3   : > { %v676_v28 = vpack.c.bf16 %v1646_v27, %v1645_v25  ;;  %v557_v29 = vpop.f32.mrb[23].mxu0  ;;  %1498 = vmatpush3.bf16.msra.mxu0 %v666_v62  ;;  %1664 = vmatpush3.bf16.msra.mxu1 %v666_v62  ;;  %v1849_v62 = vld [vmem:[%s2429_s8 + $0xa0] ss:$8 sps:$4 sm:$0xff]  }
 0x1d4   : > { %v675_v30 = vpack.c.bf16 %v557_v29, %v554_v26 }
 0x1d6   : > { %1499 = vmatprep.subr.bf16.mxu0 %v675_v30  ;;  %1657 = vmatprep.subr.bf16.mxu1 %v675_v30 }
 0x1d7   : > { %1500 = vmatpush3.bf16.msra.mxu0 %v667_v6  ;;  %1665 = vmatpush3.bf16.msra.mxu1 %v667_v6  ;;  %v1870_v6 = vld [vmem:[%s2429_s8 + $0xe0] ss:$8 sps:$4 sm:$0xff]  }
 0x1d8   : > { %v1649_v31 = vpop.f32.mrb[24].mxu0  ;;  %1501 = vmatprep.subr.bf16.mxu0 %v676_v28  ;;  %1658 = vmatprep.subr.bf16.mxu1 %v676_v28 }
 0x1d9   : > { %v570_v32 = vpop.f32.mrb[25].mxu0 }
 0x1da   : > { %v1650_v33 = vpop.f32.mrb[26].mxu0 }
 0x1db   : > { %v678_v34 = vpack.c.bf16 %v1650_v33, %v1649_v31  ;;  %v573_v35 = vpop.f32.mrb[27].mxu0  ;;  %1502 = vmatpush3.bf16.msra.mxu0 %v668_v4  ;;  %1666 = vmatpush3.bf16.msra.mxu1 %v668_v4  ;;  %v1864_v4 = vld [vmem:[%s2429_s8 + $0xd0] ss:$8 sps:$4 sm:$0xff]  }
 0x1dc   : > { %v677_v36 = vpack.c.bf16 %v573_v35, %v570_v32  ;;  %v611_v31 = vld [vmem:[%s2450_s16 + $0x50] sm:$0xff] }
 0x1dd   : > { %v603_v33 = vld [vmem:[%s2450_s16 + $0x10] sm:$0xff] }
 0x1de   : > { %1503 = vmatprep.subr.bf16.mxu0 %v677_v36  ;;  %1659 = vmatprep.subr.bf16.mxu1 %v677_v36 }
 0x1df   : > { %1504 = vmatpush3.bf16.msra.mxu0 %v669_v12  ;;  %1667 = vmatpush3.bf16.msra.mxu1 %v669_v12 }
 0x1e0   : > { %v1653_v37 = vpop.f32.mrb[28].mxu0  ;;  %1505 = vmatprep.subr.bf16.mxu0 %v678_v34  ;;  %1660 = vmatprep.subr.bf16.mxu1 %v678_v34 }
 0x1e1   : > { %v586_v38 = vpop.f32.mrb[29].mxu0 }
 0x1e2   : > { %v1654_v39 = vpop.f32.mrb[30].mxu0 }
 0x1e3   : > { %v680_v40 = vpack.c.bf16 %v1654_v39, %v1653_v37  ;;  %v589_v41 = vpop.f32.mrb[31].mxu0  ;;  %1506 = vmatpush3.bf16.msra.mxu0 %v670_v10  ;;  %1668 = vmatpush3.bf16.msra.mxu1 %v670_v10  ;;  %v612_v39 = vld [vmem:[%s2450_s16 + $0x58] sm:$0xff] }
 0x1e4   : > { %v679_v42 = vpack.c.bf16 %v589_v41, %v586_v38  ;;  %v604_v41 = vld [vmem:[%s2450_s16 + $0x18] sm:$0xff] }
 0x1e6   : > { %1507 = vmatprep.subr.bf16.mxu0 %v679_v42  ;;  %1661 = vmatprep.subr.bf16.mxu1 %v679_v42 }
 0x1e7   : > { %1508 = vmatpush3.bf16.msra.mxu0 %v671_v18  ;;  %1669 = vmatpush3.bf16.msra.mxu1 %v671_v18 }
 0x1e8   : > { %1509 = vmatprep.subr.bf16.mxu0 %v680_v40  ;;  %1662 = vmatprep.subr.bf16.mxu1 %v680_v40 }
 0x1eb   : > { %1510 = vmatpush3.bf16.msra.mxu0 %v672_v16  ;;  %1670 = vmatpush3.bf16.msra.mxu1 %v672_v16 }
 0x1ee   : > { %906 = vmatmul.mubr.bf16.vlgmr.msra.gmra.mrb[0].mxu1 %v1829_v43  ;;  %874 = vmatmul.mubr.bf16.vlgmr.msra.gmra.mrb[32].mxu0 %v1853_v44 }
 0x1ef   : > { %913 = vmatprep.mubr.bf16.mxu1 %v1832_v45  ;;  %881 = vmatprep.mubr.bf16.mxu0 %v1859_v46 }
 0x1f6   : > { %914 = vmatmul.mubr.bf16.gmra.mrb[4].mxu1 %v1834_v47  ;;  %882 = vmatmul.mubr.bf16.gmra.mrb[36].mxu0 %v1861_v48 }
 0x1f7   : > { %921 = vmatprep.mubr.bf16.mxu1 %v1835_v49  ;;  %889 = vmatprep.mubr.bf16.mxu0 %v1865_v50 }
 0x1fe   : > { %922 = vmatmul.mubr.bf16.gmra.mrb[8].mxu1 %v1837_v51  ;;  %890 = vmatmul.mubr.bf16.gmra.mrb[40].mxu0 %v1867_v52  ;;  %v613_v51 = vld [vmem:[%s2450_s16 + $0x60] sm:$0xff] }
 0x1ff   : > { %929 = vmatprep.mubr.bf16.mxu1 %v1838_v53  ;;  %897 = vmatprep.mubr.bf16.mxu0 %v1871_v54  ;;  %v605_v53 = vld [vmem:[%s2450_s16 + $0x20] sm:$0xff] }
 0x206   : > { %930 = vmatmul.mubr.bf16.gmra.mrb[12].mxu1 %v1840_v55  ;;  %898 = vmatmul.mubr.bf16.gmra.mrb[44].mxu0 %v1873_v56 }
 0x207   : > { %937 = vmatprep.mubr.bf16.mxu1 %v1841_v57 }
 0x20e   : > { %938 = vmatmul.mubr.bf16.gmra.mrb[16].mxu1 %v1843_v58 }
 0x20f   : > { %945 = vmatprep.mubr.bf16.mxu1 %v1844_v59  ;;  %v614_v59 = vld [vmem:[%s2450_s16 + $0x68] sm:$0xff] }
 0x216   : > { %946 = vmatmul.mubr.bf16.gmra.mrb[20].mxu1 %v1846_v60 }
 0x217   : > { %953 = vmatprep.mubr.bf16.mxu1 %v1847_v61  ;;  %v606_v61 = vld [vmem:[%s2450_s16 + $0x28] sm:$0xff] }
 0x21e   : > { %954 = vmatmul.mubr.bf16.gmra.mrb[24].mxu1 %v1849_v62 }
 0x21f   : > { %961 = vmatprep.mubr.bf16.mxu1 %v1850_v63 }
 0x226   : > { %962 = vmatmul.mubr.bf16.gmra.mrb[28].mxu1 %v1852_v0 }
 0x227   : > { %969 = vmatprep.mubr.bf16.mxu1 %v1856_v1 }
 0x22e   : > { %970 = vmatmul.mubr.bf16.gmra.mrb[32].mxu1 %v1858_v2 }
 0x22f   : > { %977 = vmatprep.mubr.bf16.mxu1 %v1862_v3 }
 0x236   : > { %978 = vmatmul.mubr.bf16.gmra.mrb[36].mxu1 %v1864_v4 }
 0x237   : > { %985 = vmatprep.mubr.bf16.mxu1 %v1868_v5 }
 0x23e   : > { %986 = vmatmul.mubr.bf16.gmra.mrb[40].mxu1 %v1870_v6 }
 0x23f   : > { %993 = vmatprep.mubr.bf16.mxu1 %v1874_v7  ;;  %v615_v7 = vld [vmem:[%s2450_s16 + $0x70] sm:$0xff] }
 0x246   : > { %994 = vmatmul.mubr.bf16.gmra.mrb[44].mxu1 %v1876_v8 }
 0x2c1   : > { %v1535_v9 = vpop.f32.mrb[0].mxu1  ;;  %v1511_v10 = vpop.f32.mrb[32].mxu0 }
 0x2c2   : > { %v1536_v12 = vpop.f32.mrb[1].mxu1  ;;  %v1512_v14 = vpop.f32.mrb[33].mxu0 }
 0x2c3   : > { %v1537_v15 = vadd.f32 %v1536_v12, %v1535_v9  ;;  %v1538_v16 = vpop.f32.mrb[2].mxu1  ;;  %v1513_v17 = vadd.f32 %v1512_v14, %v1511_v10  ;;  %v1514_v18 = vpop.f32.mrb[34].mxu0  ;;  %v607_v9 = vld [vmem:[%s2450_s16 + $0x30] sm:$0xff] }
 0x2c4   : > { %v1539_v20 = vpop.f32.mrb[3].mxu1  ;;  %v1515_v22 = vpop.f32.mrb[35].mxu0 }
 0x2c5   : > { %v1010_v23 = vadd.f32 %v1537_v15, %v609_v11  ;;  %v1540_v24 = vadd.f32 %v1539_v20, %v1538_v16  ;;  %v1002_v25 = vadd.f32 %v1513_v17, %v601_v13  ;;  %v1516_v26 = vadd.f32 %v1515_v22, %v1514_v18  ;;  %v616_v15 = vld [vmem:[%s2450_s16 + $0x78] sm:$0xff] }
 0x2c6   : > { %v608_v17 = vld [vmem:[%s2450_s16 + $0x38] sm:$0xff] }
 0x2c7   : > { %1042 = vst [vmem:[%s2450_s16 + $0x40] sm:$0xff] %v1010_v23  ;;  %v1011_v27 = vadd.f32 %v1540_v24, %v610_v19  ;;  %1034 = vst [vmem:[%s2450_s16] sm:$0xff] %v1002_v25  ;;  %v1003_v28 = vadd.f32 %v1516_v26, %v602_v21  ;;  %v617_v26 = vld [vmem:[%s2450_s16 + $0x80] sm:$0xff] }
 0x2c9   : > { %1043 = vst [vmem:[%s2450_s16 + $0x48] sm:$0xff] %v1011_v27  ;;  %v1541_v29 = vpop.f32.mrb[4].mxu1  ;;  %1035 = vst [vmem:[%s2450_s16 + $0x8] sm:$0xff] %v1003_v28  ;;  %v1517_v30 = vpop.f32.mrb[36].mxu0 }
 0x2ca   : > { %v1542_v32 = vpop.f32.mrb[5].mxu1  ;;  %v1518_v34 = vpop.f32.mrb[37].mxu0 }
 0x2cb   : > { %v1543_v35 = vadd.f32 %v1542_v32, %v1541_v29  ;;  %v1544_v36 = vpop.f32.mrb[6].mxu1  ;;  %v1519_v37 = vadd.f32 %v1518_v34, %v1517_v30  ;;  %v1520_v38 = vpop.f32.mrb[38].mxu0  ;;  %v618_v30 = vld [vmem:[%s2450_s16 + $0x88] sm:$0xff] }
 0x2cc   : > { %v1545_v40 = vpop.f32.mrb[7].mxu1  ;;  %v1521_v42 = vpop.f32.mrb[39].mxu0 }
 0x2cd   : > { %v1012_v43 = vadd.f32 %v1543_v35, %v611_v31  ;;  %v1546_v44 = vadd.f32 %v1545_v40, %v1544_v36  ;;  %v1004_v45 = vadd.f32 %v1519_v37, %v603_v33  ;;  %v1522_v46 = vadd.f32 %v1521_v42, %v1520_v38  ;;  %v619_v36 = vld [vmem:[%s2450_s16 + $0x90] sm:$0xff]  ;;  %v620_v40 = vld [vmem:[%s2450_s16 + $0x98] sm:$0xff] }
 0x2cf   : > { %1044 = vst [vmem:[%s2450_s16 + $0x50] sm:$0xff] %v1012_v43  ;;  %v1013_v47 = vadd.f32 %v1546_v44, %v612_v39  ;;  %1036 = vst [vmem:[%s2450_s16 + $0x10] sm:$0xff] %v1004_v45  ;;  %v1005_v48 = vadd.f32 %v1522_v46, %v604_v41  ;;  %v621_v46 = vld [vmem:[%s2450_s16 + $0xa0] sm:$0xff] }
 0x2d1   : > { %1045 = vst [vmem:[%s2450_s16 + $0x58] sm:$0xff] %v1013_v47  ;;  %v1547_v49 = vpop.f32.mrb[8].mxu1  ;;  %1037 = vst [vmem:[%s2450_s16 + $0x18] sm:$0xff] %v1005_v48  ;;  %v1523_v50 = vpop.f32.mrb[40].mxu0 }
 0x2d2   : > { %v1548_v52 = vpop.f32.mrb[9].mxu1  ;;  %v1524_v54 = vpop.f32.mrb[41].mxu0 }
 0x2d3   : > { %v1549_v55 = vadd.f32 %v1548_v52, %v1547_v49  ;;  %v1550_v56 = vpop.f32.mrb[10].mxu1  ;;  %v1525_v57 = vadd.f32 %v1524_v54, %v1523_v50  ;;  %v1526_v58 = vpop.f32.mrb[42].mxu0  ;;  %v622_v50 = vld [vmem:[%s2450_s16 + $0xa8] sm:$0xff] }
 0x2d4   : > { %v1551_v60 = vpop.f32.mrb[11].mxu1  ;;  %v1527_v62 = vpop.f32.mrb[43].mxu0 }
 0x2d5   : > { %v1014_v63 = vadd.f32 %v1549_v55, %v613_v51  ;;  %v1552_v0 = vadd.f32 %v1551_v60, %v1550_v56  ;;  %v1006_v1 = vadd.f32 %v1525_v57, %v605_v53  ;;  %v1528_v2 = vadd.f32 %v1527_v62, %v1526_v58  ;;  %v623_v56 = vld [vmem:[%s2450_s16 + $0xb0] sm:$0xff]  ;;  %v624_v60 = vld [vmem:[%s2450_s16 + $0xb8] sm:$0xff] }
 0x2d7   : > { %1046 = vst [vmem:[%s2450_s16 + $0x60] sm:$0xff] %v1014_v63  ;;  %v1015_v3 = vadd.f32 %v1552_v0, %v614_v59  ;;  %1038 = vst [vmem:[%s2450_s16 + $0x20] sm:$0xff] %v1006_v1  ;;  %v1007_v4 = vadd.f32 %v1528_v2, %v606_v61  ;;  %v625_v2 = vld [vmem:[%s2450_s16 + $0xc0] sm:$0xff] }
 0x2d9   : > { %1047 = vst [vmem:[%s2450_s16 + $0x68] sm:$0xff] %v1015_v3  ;;  %v1553_v5 = vpop.f32.mrb[12].mxu1  ;;  %1039 = vst [vmem:[%s2450_s16 + $0x28] sm:$0xff] %v1007_v4  ;;  %v1529_v6 = vpop.f32.mrb[44].mxu0 }
 0x2da   : > { %v1554_v8 = vpop.f32.mrb[13].mxu1  ;;  %v1530_v10 = vpop.f32.mrb[45].mxu0 }
 0x2db   : > { %v1555_v11 = vadd.f32 %v1554_v8, %v1553_v5  ;;  %v1556_v12 = vpop.f32.mrb[14].mxu1  ;;  %v1531_v13 = vadd.f32 %v1530_v10, %v1529_v6  ;;  %v1532_v14 = vpop.f32.mrb[46].mxu0  ;;  %v626_v6 = vld [vmem:[%s2450_s16 + $0xc8] sm:$0xff] }
 0x2dc   : > { %v1557_v16 = vpop.f32.mrb[15].mxu1  ;;  %v1533_v18 = vpop.f32.mrb[47].mxu0 }
 0x2dd   : > { %v1016_v19 = vadd.f32 %v1555_v11, %v615_v7  ;;  %v1558_v20 = vadd.f32 %v1557_v16, %v1556_v12  ;;  %v1008_v21 = vadd.f32 %v1531_v13, %v607_v9  ;;  %v1534_v22 = vadd.f32 %v1533_v18, %v1532_v14  ;;  %v627_v12 = vld [vmem:[%s2450_s16 + $0xd0] sm:$0xff]  ;;  %v628_v16 = vld [vmem:[%s2450_s16 + $0xd8] sm:$0xff] }
 0x2df   : > { %1048 = vst [vmem:[%s2450_s16 + $0x70] sm:$0xff] %v1016_v19  ;;  %v1017_v23 = vadd.f32 %v1558_v20, %v616_v15  ;;  %1040 = vst [vmem:[%s2450_s16 + $0x30] sm:$0xff] %v1008_v21  ;;  %v1009_v24 = vadd.f32 %v1534_v22, %v608_v17  ;;  %v629_v22 = vld [vmem:[%s2450_s16 + $0xe0] sm:$0xff] }
 0x2e1   : > { %1049 = vst [vmem:[%s2450_s16 + $0x78] sm:$0xff] %v1017_v23  ;;  %v1559_v25 = vpop.f32.mrb[16].mxu1  ;;  %1041 = vst [vmem:[%s2450_s16 + $0x38] sm:$0xff] %v1009_v24 }
 0x2e2   : > { %v1560_v27 = vpop.f32.mrb[17].mxu1 }
 0x2e3   : > { %v1561_v28 = vadd.f32 %v1560_v27, %v1559_v25  ;;  %v1562_v29 = vpop.f32.mrb[18].mxu1 }
 0x2e4   : > { %v1563_v31 = vpop.f32.mrb[19].mxu1 }
 0x2e5   : > { %v1018_v32 = vadd.f32 %v1561_v28, %v617_v26  ;;  %v1564_v33 = vadd.f32 %v1563_v31, %v1562_v29  ;;  %v630_v26 = vld [vmem:[%s2450_s16 + $0xe8] sm:$0xff] }
 0x2e7   : > { %1050 = vst [vmem:[%s2450_s16 + $0x80] sm:$0xff] %v1018_v32  ;;  %v1019_v34 = vadd.f32 %v1564_v33, %v618_v30  ;;  %v631_v32 = vld [vmem:[%s2450_s16 + $0xf0] sm:$0xff] }
 0x2e9   : > { %1051 = vst [vmem:[%s2450_s16 + $0x88] sm:$0xff] %v1019_v34  ;;  %v1565_v35 = vpop.f32.mrb[20].mxu1 }
 0x2ea   : > { %v1566_v37 = vpop.f32.mrb[21].mxu1 }
 0x2eb   : > { %v1567_v38 = vadd.f32 %v1566_v37, %v1565_v35  ;;  %v1568_v39 = vpop.f32.mrb[22].mxu1 }
 0x2ec   : > { %v1569_v41 = vpop.f32.mrb[23].mxu1 }
 0x2ed   : > { %v1020_v42 = vadd.f32 %v1567_v38, %v619_v36  ;;  %v1570_v43 = vadd.f32 %v1569_v41, %v1568_v39  ;;  %v632_v36 = vld [vmem:[%s2450_s16 + $0xf8] sm:$0xff]  ;;  %v1070_v41 = vld [vmem:[%s2450_s16] sm:$0xff] (!%p1461_p5) }
 0x2ef   : > { %1052 = vst [vmem:[%s2450_s16 + $0x90] sm:$0xff] %v1020_v42  ;;  %v1021_v44 = vadd.f32 %v1570_v43, %v620_v40  ;;  %v2618_v42 = vld [vmem:[%s2863_s14] ss:$0 sm:$0xff] (!%p1461_p5)  ;;  %v1071_v43 = vld [vmem:[%s2450_s16 + $0x8] sm:$0xff] (!%p1461_p5) }
 0x2f1   : > { %1053 = vst [vmem:[%s2450_s16 + $0x98] sm:$0xff] %v1021_v44  ;;  %v1571_v45 = vpop.f32.mrb[24].mxu1  ;;  %v1109_v44 = vadd.f32 (!%p1461_p5), %v2618_v42, %v1070_v41 }
 0x2f2   : > { %v1572_v47 = vpop.f32.mrb[25].mxu1 }
 0x2f3   : > { %v1573_v48 = vadd.f32 %v1572_v47, %v1571_v45  ;;  %v1574_v49 = vpop.f32.mrb[26].mxu1  ;;  %v1110_v45 = vadd.f32 (!%p1461_p5), %v2618_v42, %v1071_v43  ;;  %v1073_v47 = vld [vmem:[%s2450_s16 + $0x18] sm:$0xff] (!%p1461_p5)  ;;  %vm1141_vm0 = vcmp.gt.f32.partialorder (!%p1461_p5), %v1109_v44, 0.0 }
 0x2f4   : > { %v1575_v51 = vpop.f32.mrb[27].mxu1 }
 0x2f5   : > { %v1022_v52 = vadd.f32 %v1573_v48, %v621_v46  ;;  %v1576_v53 = vadd.f32 %v1575_v51, %v1574_v49  ;;  %v1072_v46 = vld [vmem:[%s2450_s16 + $0x10] sm:$0xff] (!%p1461_p5)  ;;  %v1074_v48 = vld [vmem:[%s2450_s16 + $0x20] sm:$0xff] (!%p1461_p5)  ;;  %vm1142_vm1 = vcmp.gt.f32.partialorder (!%p1461_p5), %v1110_v45, 0.0 }
 0x2f6   : > { %v1111_v49 = vadd.f32 (!%p1461_p5), %v2618_v42, %v1072_v46  ;;  %v1113_v51 = vadd.f32 (!%p1461_p5), %v2618_v42, %v1074_v48 }
 0x2f7   : > { %1054 = vst [vmem:[%s2450_s16 + $0xa0] sm:$0xff] %v1022_v52  ;;  %v1023_v54 = vadd.f32 %v1576_v53, %v622_v50  ;;  %v1112_v50 = vadd.f32 (!%p1461_p5), %v2618_v42, %v1073_v47  ;;  %v1075_v52 = vld [vmem:[%s2450_s16 + $0x28] sm:$0xff] (!%p1461_p5)  ;;  %v1076_v53 = vld [vmem:[%s2450_s16 + $0x30] sm:$0xff] (!%p1461_p5) }
 0x2f8   : > { %vm1143_vm2 = vcmp.gt.f32.partialorder (!%p1461_p5), %v1111_v49, 0.0  ;;  %vm1145_vm4 = vcmp.gt.f32.partialorder (!%p1461_p5), %v1113_v51, 0.0 }
 0x2f9   : > { %1055 = vst [vmem:[%s2450_s16 + $0xa8] sm:$0xff] %v1023_v54  ;;  %v1577_v55 = vpop.f32.mrb[28].mxu1  ;;  %v1077_v54 = vld [vmem:[%s2450_s16 + $0x38] sm:$0xff] (!%p1461_p5)  ;;  %vm1144_vm3 = vcmp.gt.f32.partialorder (!%p1461_p5), %v1112_v50, 0.0 }
 0x2fa   : > { %v1578_v57 = vpop.f32.mrb[29].mxu1 }
 0x2fb   : > { %v1579_v58 = vadd.f32 %v1578_v57, %v1577_v55  ;;  %v1580_v59 = vpop.f32.mrb[30].mxu1  ;;  %v1173_v55 = vmul.f32 (!%p1461_p5), 0.2, %v1109_v44  ;;  %v1175_v57 = vmul.f32 (!%p1461_p5), 0.2, %v1111_v49 }
 0x2fc   : > { %v1581_v61 = vpop.f32.mrb[31].mxu1 }
 0x2fd   : > { %v1024_v62 = vadd.f32 %v1579_v58, %v623_v56  ;;  %v1582_v63 = vadd.f32 %v1581_v61, %v1580_v59  ;;  %v1174_v56 = vmul.f32 (!%p1461_p5), 0.2, %v1110_v45  ;;  %v1176_v58 = vmul.f32 (!%p1461_p5), 0.2, %v1112_v50 }
 0x2fe   : > { %v1205_v59 = vsel (!%p1461_p5), %vm1141_vm0, %v1109_v44, %v1173_v55  ;;  %v1177_v61 = vmul.f32 (!%p1461_p5), 0.2, %v1113_v51 }
 0x2ff   : > { %1056 = vst [vmem:[%s2450_s16 + $0xb0] sm:$0xff] %v1024_v62  ;;  %v1025_v0 = vadd.f32 %v1582_v63, %v624_v60  ;;  %v1206_v60 = vsel (!%p1461_p5), %vm1142_vm1, %v1110_v45, %v1174_v56  ;;  %v1078_v62 = vld [vmem:[%s2450_s16 + $0x40] sm:$0xff] (!%p1461_p5)  ;;  %v1079_v63 = vld [vmem:[%s2450_s16 + $0x48] sm:$0xff] (!%p1461_p5)  ;;  %1237 = vst [vmem:[%s2450_s16] sm:$0xff] (!%p1461_p5), %v1205_v59 }
 0x300   : > { %1238 = vst [vmem:[%s2450_s16 + $0x8] sm:$0xff] (!%p1461_p5), %v1206_v60  ;;  %v1090_v45 = vld [vmem:[%s2450_s16 + $0xa0] sm:$0xff] (!%p1461_p5)  ;;  %v1091_v46 = vld [vmem:[%s2450_s16 + $0xa8] sm:$0xff] (!%p1461_p5) }
 0x301   : > { %1057 = vst [vmem:[%s2450_s16 + $0xb8] sm:$0xff] %v1025_v0  ;;  %v1583_v1 = vpop.f32.mrb[32].mxu1  ;;  %v1207_v0 = vsel (!%p1461_p5), %vm1143_vm2, %v1111_v49, %v1175_v57 }
 0x302   : > { %v1584_v3 = vpop.f32.mrb[33].mxu1  ;;  %1239 = vst [vmem:[%s2450_s16 + $0x10] sm:$0xff] (!%p1461_p5), %v1207_v0  ;;  %v1130_v0 = vadd.f32 (!%p1461_p5), %v2618_v42, %v1091_v46 }
 0x303   : > { %v1585_v4 = vadd.f32 %v1584_v3, %v1583_v1  ;;  %v1586_v5 = vpop.f32.mrb[34].mxu1  ;;  %v1208_v1 = vsel (!%p1461_p5), %vm1144_vm3, %v1112_v50, %v1176_v58  ;;  %v1115_v3 = vadd.f32 (!%p1461_p5), %v2618_v42, %v1076_v53 }
 0x304   : > { %v1587_v7 = vpop.f32.mrb[35].mxu1  ;;  %1240 = vst [vmem:[%s2450_s16 + $0x18] sm:$0xff] (!%p1461_p5), %v1208_v1 }
 0x305   : > { %v1026_v8 = vadd.f32 %v1585_v4, %v625_v2  ;;  %v1588_v9 = vadd.f32 %v1587_v7, %v1586_v5  ;;  %v1114_v2 = vadd.f32 (!%p1461_p5), %v2618_v42, %v1075_v52  ;;  %v1080_v4 = vld [vmem:[%s2450_s16 + $0x50] sm:$0xff] (!%p1461_p5)  ;;  %v1081_v5 = vld [vmem:[%s2450_s16 + $0x58] sm:$0xff] (!%p1461_p5)  ;;  %v1116_v7 = vadd.f32 (!%p1461_p5), %v2618_v42, %v1077_v54 }
 0x306   : > { %vm1147_vm6 = vcmp.gt.f32.partialorder (!%p1461_p5), %v1115_v3, 0.0 }
 0x307   : > { %1058 = vst [vmem:[%s2450_s16 + $0xc0] sm:$0xff] %v1026_v8  ;;  %v1027_v10 = vadd.f32 %v1588_v9, %v626_v6  ;;  %v1209_v6 = vsel (!%p1461_p5), %vm1145_vm4, %v1113_v51, %v1177_v61  ;;  %v1117_v8 = vadd.f32 (!%p1461_p5), %v2618_v42, %v1078_v62  ;;  %v1118_v9 = vadd.f32 (!%p1461_p5), %v2618_v42, %v1079_v63  ;;  %v1092_v51 = vld [vmem:[%s2450_s16 + $0xb0] sm:$0xff] (!%p1461_p5) }
 0x308   : > { %1241 = vst [vmem:[%s2450_s16 + $0x20] sm:$0xff] (!%p1461_p5), %v1209_v6  ;;  %vm1146_vm5 = vcmp.gt.f32.partialorder (!%p1461_p5), %v1114_v2, 0.0  ;;  %vm1148_vm7 = vcmp.gt.f32.partialorder (!%p1461_p5), %v1116_v7, 0.0  ;;  %v1093_v52 = vld [vmem:[%s2450_s16 + $0xb8] sm:$0xff] (!%p1461_p5)  ;;  %v1129_v63 = vadd.f32 (!%p1461_p5), %v2618_v42, %v1090_v45 }
 0x309   : > { %1059 = vst [vmem:[%s2450_s16 + $0xc8] sm:$0xff] %v1027_v10  ;;  %v1589_v11 = vpop.f32.mrb[36].mxu1  ;;  %v1082_v10 = vld [vmem:[%s2450_s16 + $0x60] sm:$0xff] (!%p1461_p5)  ;;  %vm1149_vm8 = vcmp.gt.f32.partialorder (!%p1461_p5), %v1117_v8, 0.0  ;;  %vm1150_vm9 = vcmp.gt.f32.partialorder (!%p1461_p5), %v1118_v9, 0.0 }
 0x30a   : > { %v1590_v13 = vpop.f32.mrb[37].mxu1  ;;  %vm1161_vm4 = vcmp.gt.f32.partialorder (!%p1461_p5), %v1129_v63, 0.0 }
 0x30b   : > { %v1591_v14 = vadd.f32 %v1590_v13, %v1589_v11  ;;  %v1592_v15 = vpop.f32.mrb[38].mxu1  ;;  %v1083_v11 = vld [vmem:[%s2450_s16 + $0x68] sm:$0xff] (!%p1461_p5)  ;;  %v1178_v13 = vmul.f32 (!%p1461_p5), 0.2, %v1114_v2 }
 0x30c   : > { %v1593_v17 = vpop.f32.mrb[39].mxu1 }
 0x30d   : > { %v1028_v18 = vadd.f32 %v1591_v14, %v627_v12  ;;  %v1594_v19 = vadd.f32 %v1593_v17, %v1592_v15  ;;  %v1084_v12 = vld [vmem:[%s2450_s16 + $0x70] sm:$0xff] (!%p1461_p5)  ;;  %v1179_v14 = vmul.f32 (!%p1461_p5), 0.2, %v1115_v3  ;;  %v1180_v15 = vmul.f32 (!%p1461_p5), 0.2, %v1116_v7 }
 0x30e   : > { %v1210_v17 = vsel (!%p1461_p5), %vm1146_vm5, %v1114_v2, %v1178_v13  ;;  %v1094_v53 = vld [vmem:[%s2450_s16 + $0xc0] sm:$0xff] (!%p1461_p5)  ;;  %vm1162_vm5 = vcmp.gt.f32.partialorder (!%p1461_p5), %v1130_v0, 0.0 }
 0x30f   : > { %1060 = vst [vmem:[%s2450_s16 + $0xd0] sm:$0xff] %v1028_v18  ;;  %v1029_v20 = vadd.f32 %v1594_v19, %v628_v16  ;;  %v1181_v16 = vmul.f32 (!%p1461_p5), 0.2, %v1117_v8  ;;  %v1211_v18 = vsel (!%p1461_p5), %vm1147_vm6, %v1115_v3, %v1179_v14  ;;  %v1182_v19 = vmul.f32 (!%p1461_p5), 0.2, %v1118_v9  ;;  %1242 = vst [vmem:[%s2450_s16 + $0x28] sm:$0xff] (!%p1461_p5), %v1210_v17 }
 0x310   : > { %1243 = vst [vmem:[%s2450_s16 + $0x30] sm:$0xff] (!%p1461_p5), %v1211_v18  ;;  %v1095_v1 = vld [vmem:[%s2450_s16 + $0xc8] sm:$0xff] (!%p1461_p5)  ;;  %v1133_v6 = vadd.f32 (!%p1461_p5), %v2618_v42, %v1094_v53 }
 0x311   : > { %1061 = vst [vmem:[%s2450_s16 + $0xd8] sm:$0xff] %v1029_v20  ;;  %v1595_v21 = vpop.f32.mrb[40].mxu1  ;;  %v1212_v20 = vsel (!%p1461_p5), %vm1148_vm7, %v1116_v7, %v1180_v15 }
 0x312   : > { %v1596_v23 = vpop.f32.mrb[41].mxu1  ;;  %1244 = vst [vmem:[%s2450_s16 + $0x38] sm:$0xff] (!%p1461_p5), %v1212_v20 }
 0x313   : > { %v1597_v24 = vadd.f32 %v1596_v23, %v1595_v21  ;;  %v1598_v25 = vpop.f32.mrb[42].mxu1  ;;  %v1213_v21 = vsel (!%p1461_p5), %vm1149_vm8, %v1117_v8, %v1181_v16  ;;  %v1120_v23 = vadd.f32 (!%p1461_p5), %v2618_v42, %v1081_v5  ;;  %v1132_v5 = vadd.f32 (!%p1461_p5), %v2618_v42, %v1093_v52 }
 0x314   : > { %v1599_v27 = vpop.f32.mrb[43].mxu1  ;;  %1245 = vst [vmem:[%s2450_s16 + $0x40] sm:$0xff] (!%p1461_p5), %v1213_v21  ;;  %vm1165_vm8 = vcmp.gt.f32.partialorder (!%p1461_p5), %v1133_v6, 0.0  ;;  %v1197_v16 = vmul.f32 (!%p1461_p5), 0.2, %v1133_v6 }
 0x315   : > { %v1030_v28 = vadd.f32 %v1597_v24, %v629_v22  ;;  %v1600_v29 = vadd.f32 %v1599_v27, %v1598_v25  ;;  %v1119_v22 = vadd.f32 (!%p1461_p5), %v2618_v42, %v1080_v4  ;;  %v1085_v24 = vld [vmem:[%s2450_s16 + $0x78] sm:$0xff] (!%p1461_p5)  ;;  %v1086_v25 = vld [vmem:[%s2450_s16 + $0x80] sm:$0xff] (!%p1461_p5)  ;;  %v1121_v27 = vadd.f32 (!%p1461_p5), %v2618_v42, %v1082_v10 }
 0x316   : > { %vm1152_vm11 = vcmp.gt.f32.partialorder (!%p1461_p5), %v1120_v23, 0.0  ;;  %v1124_v43 = vadd.f32 (!%p1461_p5), %v2618_v42, %v1085_v24  ;;  %v1125_v44 = vadd.f32 (!%p1461_p5), %v2618_v42, %v1086_v25  ;;  %v1096_v2 = vld [vmem:[%s2450_s16 + $0xd0] sm:$0xff] (!%p1461_p5)  ;;  %v1131_v4 = vadd.f32 (!%p1461_p5), %v2618_v42, %v1092_v51 }
 0x317   : > { %1062 = vst [vmem:[%s2450_s16 + $0xe0] sm:$0xff] %v1030_v28  ;;  %v1031_v30 = vadd.f32 %v1600_v29, %v630_v26  ;;  %v1214_v26 = vsel (!%p1461_p5), %vm1150_vm9, %v1118_v9, %v1182_v19  ;;  %v1122_v28 = vadd.f32 (!%p1461_p5), %v2618_v42, %v1083_v11  ;;  %v1123_v29 = vadd.f32 (!%p1461_p5), %v2618_v42, %v1084_v12 }
 0x318   : > { %1246 = vst [vmem:[%s2450_s16 + $0x48] sm:$0xff] (!%p1461_p5), %v1214_v26  ;;  %vm1151_vm10 = vcmp.gt.f32.partialorder (!%p1461_p5), %v1119_v22, 0.0  ;;  %vm1153_vm12 = vcmp.gt.f32.partialorder (!%p1461_p5), %v1121_v27, 0.0  ;;  %vm1156_vm15 = vcmp.gt.f32.partialorder (!%p1461_p5), %v1124_v43, 0.0  ;;  %v1188_v54 = vmul.f32 (!%p1461_p5), 0.2, %v1124_v43 }
 0x319   : > { %1063 = vst [vmem:[%s2450_s16 + $0xe8] sm:$0xff] %v1031_v30  ;;  %v1601_v31 = vpop.f32.mrb[44].mxu1  ;;  %v1087_v30 = vld [vmem:[%s2450_s16 + $0x88] sm:$0xff] (!%p1461_p5)  ;;  %vm1154_vm13 = vcmp.gt.f32.partialorder (!%p1461_p5), %v1122_v28, 0.0  ;;  %vm1155_vm14 = vcmp.gt.f32.partialorder (!%p1461_p5), %v1123_v29, 0.0  ;;  %vm1157_vm0 = vcmp.gt.f32.partialorder (!%p1461_p5), %v1125_v44, 0.0  ;;  %v1134_v19 = vadd.f32 (!%p1461_p5), %v2618_v42, %v1095_v1 }
 0x31a   : > { %v1602_v33 = vpop.f32.mrb[45].mxu1  ;;  %v1126_v48 = vadd.f32 (!%p1461_p5), %v2618_v42, %v1087_v30  ;;  %v1189_v55 = vmul.f32 (!%p1461_p5), 0.2, %v1125_v44  ;;  %v1220_v58 = vsel (!%p1461_p5), %vm1156_vm15, %v1124_v43, %v1188_v54  ;;  %v1097_v7 = vld [vmem:[%s2450_s16 + $0xd8] sm:$0xff] (!%p1461_p5)  ;;  %v1193_v10 = vmul.f32 (!%p1461_p5), 0.2, %v1129_v63 }
 0x31b   : > { %v1603_v34 = vadd.f32 %v1602_v33, %v1601_v31  ;;  %v1604_v35 = vpop.f32.mrb[46].mxu1  ;;  %1069 = sbr.rel (%p1461_p5) target bundleno = 815 (0x32f), region = 56  ;;  %v1088_v31 = vld [vmem:[%s2450_s16 + $0x90] sm:$0xff] (!%p1461_p5)  ;;  %v1183_v33 = vmul.f32 (!%p1461_p5), 0.2, %v1119_v22  ;;  %1252 = vst [vmem:[%s2450_s16 + $0x78] sm:$0xff] (!%p1461_p5), %v1220_v58  ;;  %v1135_v20 = vadd.f32 (!%p1461_p5), %v2618_v42, %v1096_v2  ;;  %v1229_v21 = vsel (!%p1461_p5), %vm1165_vm8, %v1133_v6, %v1197_v16 }
 0x31c   : > { %v1605_v37 = vpop.f32.mrb[47].mxu1  ;;  %v1127_v49 = vadd.f32 (!%p1461_p5), %v2618_v42, %v1088_v31  ;;  %vm1158_vm1 = vcmp.gt.f32.partialorder (!%p1461_p5), %v1126_v48, 0.0  ;;  %v1190_v56 = vmul.f32 (!%p1461_p5), 0.2, %v1126_v48  ;;  %v1221_v59 = vsel (!%p1461_p5), %vm1157_vm0, %v1125_v44, %v1189_v55  ;;  %1261 = vst [vmem:[%s2450_s16 + $0xc0] sm:$0xff] (!%p1461_p5), %v1229_v21 }
 0x31d   : > { %v1032_v38 = vadd.f32 %v1603_v34, %v631_v32  ;;  %v1606_v39 = vadd.f32 %v1605_v37, %v1604_v35  ;;  %v1089_v32 = vld [vmem:[%s2450_s16 + $0x98] sm:$0xff] (!%p1461_p5)  ;;  %v1184_v34 = vmul.f32 (!%p1461_p5), 0.2, %v1120_v23  ;;  %v1185_v35 = vmul.f32 (!%p1461_p5), 0.2, %v1121_v27  ;;  %1253 = vst [vmem:[%s2450_s16 + $0x80] sm:$0xff] (!%p1461_p5), %v1221_v59 }
 0x31e   : > { %v1215_v37 = vsel (!%p1461_p5), %vm1151_vm10, %v1119_v22, %v1183_v33  ;;  %v1128_v50 = vadd.f32 (!%p1461_p5), %v2618_v42, %v1089_v32  ;;  %vm1159_vm2 = vcmp.gt.f32.partialorder (!%p1461_p5), %v1127_v49, 0.0  ;;  %v1191_v57 = vmul.f32 (!%p1461_p5), 0.2, %v1127_v49  ;;  %v1098_v8 = vld [vmem:[%s2450_s16 + $0xe0] sm:$0xff] (!%p1461_p5) }
 0x31f   : > { %1064 = vst [vmem:[%s2450_s16 + $0xf0] sm:$0xff] %v1032_v38  ;;  %v1033_v40 = vadd.f32 %v1606_v39, %v632_v36  ;;  %v1186_v36 = vmul.f32 (!%p1461_p5), 0.2, %v1122_v28  ;;  %v1216_v38 = vsel (!%p1461_p5), %vm1152_vm11, %v1120_v23, %v1184_v34  ;;  %v1187_v39 = vmul.f32 (!%p1461_p5), 0.2, %v1123_v29  ;;  %1247 = vst [vmem:[%s2450_s16 + $0x50] sm:$0xff] (!%p1461_p5), %v1215_v37 }
 0x320   : > { %1248 = vst [vmem:[%s2450_s16 + $0x58] sm:$0xff] (!%p1461_p5), %v1216_v38  ;;  %vm1160_vm3 = vcmp.gt.f32.partialorder (!%p1461_p5), %v1128_v50, 0.0  ;;  %v1192_v60 = vmul.f32 (!%p1461_p5), 0.2, %v1128_v50  ;;  %v1222_v61 = vsel (!%p1461_p5), %vm1158_vm1, %v1126_v48, %v1190_v56  ;;  %v1223_v62 = vsel (!%p1461_p5), %vm1159_vm2, %v1127_v49, %v1191_v57  ;;  %v1099_v9 = vld [vmem:[%s2450_s16 + $0xe8] sm:$0xff] (!%p1461_p5) }
 0x321   : > { %1065 = vst [vmem:[%s2450_s16 + $0xf8] sm:$0xff] %v1033_v40  ;;  %v1217_v40 = vsel (!%p1461_p5), %vm1153_vm12, %v1121_v27, %v1185_v35  ;;  %v1218_v41 = vsel (!%p1461_p5), %vm1154_vm13, %v1122_v28, %v1186_v36  ;;  %v1219_v47 = vsel (!%p1461_p5), %vm1155_vm14, %v1123_v29, %v1187_v39  ;;  %1254 = vst [vmem:[%s2450_s16 + $0x88] sm:$0xff] (!%p1461_p5), %v1222_v61  ;;  %v1194_v11 = vmul.f32 (!%p1461_p5), 0.2, %v1130_v0 }
 0x322   : > { %1249 = vst [vmem:[%s2450_s16 + $0x60] sm:$0xff] %v1217_v40  ;;  %1250 = vst [vmem:[%s2450_s16 + $0x68] sm:$0xff] %v1218_v41  ;;  %v1224_v3 = vsel %vm1160_vm3, %v1128_v50, %v1192_v60  ;;  %vm1163_vm6 = vcmp.gt.f32.partialorder %v1131_v4, 0.0  ;;  %v1195_v12 = vmul.f32 0.2, %v1131_v4  ;;  %vm1164_vm7 = vcmp.gt.f32.partialorder %v1132_v5, 0.0 }
 0x323   : > { %1251 = vst [vmem:[%s2450_s16 + $0x70] sm:$0xff] %v1219_v47  ;;  %1255 = vst [vmem:[%s2450_s16 + $0x90] sm:$0xff] %v1223_v62  ;;  %v1196_v13 = vmul.f32 0.2, %v1132_v5  ;;  %v1225_v14 = vsel %vm1161_vm4, %v1129_v63, %v1193_v10  ;;  %v1226_v15 = vsel %vm1162_vm5, %v1130_v0, %v1194_v11  ;;  %v1136_v22 = vadd.f32 %v2618_v42, %v1097_v7 }
 0x324   : > { %1256 = vst [vmem:[%s2450_s16 + $0x98] sm:$0xff] %v1224_v3  ;;  %1257 = vst [vmem:[%s2450_s16 + $0xa0] sm:$0xff] %v1225_v14  ;;  %v1227_v17 = vsel %vm1163_vm6, %v1131_v4, %v1195_v12  ;;  %v1137_v23 = vadd.f32 %v2618_v42, %v1098_v8  ;;  %v1138_v24 = vadd.f32 %v2618_v42, %v1099_v9  ;;  %vm1166_vm9 = vcmp.gt.f32.partialorder %v1134_v19, 0.0 }
 0x325   : > { %1258 = vst [vmem:[%s2450_s16 + $0xa8] sm:$0xff] %v1226_v15  ;;  %v1228_v18 = vsel %vm1164_vm7, %v1132_v5, %v1196_v13  ;;  %1259 = vst [vmem:[%s2450_s16 + $0xb0] sm:$0xff] %v1227_v17  ;;  %v1198_v27 = vmul.f32 0.2, %v1134_v19  ;;  %vm1167_vm10 = vcmp.gt.f32.partialorder %v1135_v20, 0.0  ;;  %vm1168_vm11 = vcmp.gt.f32.partialorder %v1136_v22, 0.0 }
 0x326   : > { %1260 = vst [vmem:[%s2450_s16 + $0xb8] sm:$0xff] %v1228_v18  ;;  %v1100_v25 = vld [vmem:[%s2450_s16 + $0xf0] sm:$0xff]  ;;  %v1199_v28 = vmul.f32 0.2, %v1135_v20  ;;  %v1200_v29 = vmul.f32 0.2, %v1136_v22 }
 0x327   : > { %vm1169_vm12 = vcmp.gt.f32.partialorder %v1137_v23, 0.0  ;;  %v1201_v30 = vmul.f32 0.2, %v1137_v23  ;;  %v1230_v31 = vsel %vm1166_vm9, %v1134_v19, %v1198_v27  ;;  %vm1170_vm13 = vcmp.gt.f32.partialorder %v1138_v24, 0.0 }
 0x328   : > { %v1101_v26 = vld [vmem:[%s2450_s16 + $0xf8] sm:$0xff]  ;;  %v1231_v32 = vsel %vm1167_vm10, %v1135_v20, %v1199_v28  ;;  %v1202_v33 = vmul.f32 0.2, %v1138_v24  ;;  %1262 = vst [vmem:[%s2450_s16 + $0xc8] sm:$0xff] %v1230_v31  ;;  %v1232_v34 = vsel %vm1168_vm11, %v1136_v22, %v1200_v29  ;;  %v1139_v36 = vadd.f32 %v2618_v42, %v1100_v25 }
 0x329   : > { %1263 = vst [vmem:[%s2450_s16 + $0xd0] sm:$0xff] %v1231_v32  ;;  %v1233_v35 = vsel %vm1169_vm12, %v1137_v23, %v1201_v30  ;;  %v1140_v37 = vadd.f32 %v2618_v42, %v1101_v26  ;;  %1264 = vst [vmem:[%s2450_s16 + $0xd8] sm:$0xff] %v1232_v34 }
 0x32a   : > { %1265 = vst [vmem:[%s2450_s16 + $0xe0] sm:$0xff] %v1233_v35  ;;  %v1234_v38 = vsel %vm1170_vm13, %v1138_v24, %v1202_v33  ;;  %vm1171_vm14 = vcmp.gt.f32.partialorder %v1139_v36, 0.0  ;;  %v1203_v39 = vmul.f32 0.2, %v1139_v36 }
 0x32b   : > { %1266 = vst [vmem:[%s2450_s16 + $0xe8] sm:$0xff] %v1234_v38  ;;  %vm1172_vm15 = vcmp.gt.f32.partialorder %v1140_v37, 0.0  ;;  %v1204_v40 = vmul.f32 0.2, %v1140_v37 }
 0x32c   : > { %v1235_v41 = vsel %vm1171_vm14, %v1139_v36, %v1203_v39 }
 0x32d   : > { %v1236_v43 = vsel %vm1172_vm15, %v1140_v37, %v1204_v40  ;;  %1267 = vst [vmem:[%s2450_s16 + $0xf0] sm:$0xff] %v1235_v41 }
 0x32e   : > { %1268 = vst [vmem:[%s2450_s16 + $0xf8] sm:$0xff] %v1236_v43 }
 0x32f PF: > { %s2864_s29 = sld [smem:[#allocation16_spill]]  ;;  %s2866_s13 = sld [smem:[#allocation19_spill]] }
 0x330   : > { %s2867_s25 = sld [smem:[#allocation25_spill]]  ;;  %s1283_s6 = sshll.u32 %s2450_s16, 4  ;;  %s2722_s6 = int_to_ptr.vmem [resolvable:$true] %s1283_s6 }
 0x331   : > { %s2726_s2 = scalar_lea.sflag [#allocation4], %s284_s21  ;;  %s1965_s11 = scalar_lea.vmem %s2722_s6, 4096 }
 0x332   : > { %p1966_p2 = scmp.ne.s32.totalorder %s2722_s6, %s1965_s11  ;;  %s2130_s5 = smov [#allocation8]  }
 0x333   : > { %s1969_s24 = sshll.u32 %s2130_s5, 4  ;;  %s1970_s24 = int_to_ptr.vmem [resolvable:$false] %s1969_s24 }
 0x334   : > { %s1971_s3 = scalar_lea.vmem %s1970_s24, 8192  ;;  %p1972_p4 = scmp.lt.s32.totalorder %s2722_s6, %s1970_s24 }
 0x335   : > { %s1470_s30 = sshll.u32 %s2864_s29, 12  ;;  %p2869_p10 = scmp.ne.s32.totalorder %s2866_s13, 0 }
 0x336   : > { %s2868_s10 = smov %s2867_s25  ;;  %s2719_s9 = scalar_lea.hbm %s2867_s25, %s1470_s30 }
 0x337   : > { %p1967_p7 = pnand %p1966_p2, %p2869_p10  ;;  %p1973_p8 = scmp.lt.s32.totalorder %s1971_s3, %s1965_s11 }
 0x339   : > { %p1968_p11 = pneg %p1967_p7  ;;  %p1974_p12 = por %p1973_p8, %p1972_p4 }
 0x33b   : > { %p1975_p13 = pnand %p1974_p12, %p1968_p11 }
 0x33d   : > { %1978 = shalt.err (!%p1975_p13)
}
 0x33e   : > { %s1979_s21 = scalar_lea.hbm %s2719_s9, 4096  ;;  %s1983_s29 = scalar_lea.hbm %s2868_s10, 8192 }
 0x33f   : > { %p1980_p6 = scmp.ne.s32.totalorder %s2719_s9, %s1979_s21  ;;  %p1984_p3 = scmp.lt.u32.totalorder %s2719_s9, %s2868_s10 }
 0x340   : > { %p1985_p9 = scmp.lt.u32.totalorder %s1983_s29, %s1979_s21  ;;  %p1987_p2 = scmp.lt.u32.totalorder %s1979_s21, %s2719_s9 }
 0x341   : > { %p1981_p0 = pnand %p1980_p6, %p2869_p10 }
 0x342   : > { %p1986_p5 = por %p1985_p9, %p1984_p3 }
 0x343   : > { %p1982_p1 = pneg %p1981_p0 }
 0x344   : > { %p1988_p7 = por %p1987_p2, %p1986_p5 }
 0x346   : > { %p1989_p11 = pnand %p1988_p7, %p1982_p1 }
 0x348   : > { %1992 = shalt.err (!%p1989_p11)
}
 0x349   : > { %s2131_s12 = smov 128   ;;  %s2132_s18 = smov 8  }
 0x34a   : > { %1679 = dma.vmem_to_hbm [thread:$0]  (%p2869_p10), %s2722_s6, 4096, %s2719_s9, %s2726_s2, %s2131_s12, %s2131_s12, %s2132_s18  }
 0x34b PF: > { %s2870_s25 = sld [smem:[#allocation13_spill]]  ;;  %s2871_s11 = sld [smem:[#allocation20_spill]] }
 0x34c   : > { %p1699_p4 = scmp.ge.s32.totalorder %s2119_s28, 2 }
 0x351   : > { %s1298_s5 = sand.u32 1, %s2870_s25   ;;  %p2872_p8 = scmp.ne.s32.totalorder %s2871_s11, 0 }
 0x352   : > { %s1299_s24 = scalar_lea.sflag [#allocation4], %s1298_s5 }
 0x353   : > { %p1693_p12 = pnand %p1699_p4, %p2872_p8 }
 0x355   : > { %2062 = dma.done.wait (!%p1693_p12), %s1299_s24, 4096  }
 0x356   : > { %2064 = vsyncadd (!%p1693_p12), %s1299_s24, 4294963200  ;;  %s23_s28 = sadd.s32 1, %s2119_s28   ;;  %s2874_s21 = sld [smem:[#allocation14_spill]] }
 0x357   : > { %p2755_p13 = scmp.ge.s32.totalorder %s23_s28, 6   ;;  %s2875_s13 = smov %s2318_s15 }
 0x358   : > { %s2876_s9 = sld [smem:[#allocation21_spill]]  ;;  %s2877_s6 = sld [smem:[#allocation22_spill]] }
 0x359   : > { %s2879_s16 = smov %s2075_s17  ;;  %s2880_s17 = smov %s2875_s13 }
 0x35a   : > { %s2881_s18 = smov %s2083_s19  ;;  %s2882_s19 = smov %s2087_s20 }
 0x35b   : > { %s2883_s20 = smov %s2376_s7  ;;  %s2887_s24 = smov %s2111_s26 }
 0x35c   : > { %s2878_s15 = smov %s2874_s21  ;;  %s2884_s21 = smov %s2095_s22 }
 0x35d   : > { %s2885_s22 = smov %s2099_s23  ;;  %s2886_s23 = smov %s2321_s4 }
 0x35e   : > { %s2888_s25 = smov %s2115_s27  ;;  %s2889_s26 = smov %s2876_s9 }
 0x35f   : > { %s2890_s27 = smov %s2877_s6  ;;  %22 = sbr.rel (!%p2755_p13) target bundleno = 16 (0x10), region = 106 }
 0x366   :  { %1304 = vsyncpa [#allocation3], 1 }
 0x367   :  { %1306 = vsyncpa [#allocation3 + $0x1], 1 }
 0x368   :  { %1307 = vsyncpa [#allocation6], 1 }
 0x369   :  { %1309 = vsyncpa [#allocation6 + $0x1], 1 }
 0x36a   :  { %1310 = vsyncpa [#allocation4], 1 }
 0x36b   :  { %1312 = vsyncpa [#allocation4 + $0x1], 1 }

</bundles_post_ra>
